<compile_context>
chip_gen: v5e
topology: v5e:2x2
jax: 0.10.0
libtpu: 0.0.40
codegen_flags: <defaults>
</compile_context>

<pallas_src>
import jax
import jax.numpy as jnp
from jax.experimental import pallas as pl
from jax.experimental.pallas import tpu as pltpu

# Forward/backward consistency thresholds (standard UnFlow-style values).
ALPHA1 = 0.01
ALPHA2 = 0.5


def _pick_block(n, target):
    """Largest divisor of n that is <= target (pairs per grid step)."""
    nb = max(1, min(target, n))
    while n % nb:
        nb -= 1
    return nb


# ----------------------------------------------------------------------------
# Pallas kernel
# ----------------------------------------------------------------------------
def _make_kernel(C, H, W):
    HW = H * W
    inv_w = 2.0 / W
    inv_h = 2.0 / H

    def kernel(img0_ref, img1_ref, ff_ref, fb_ref, ffr_ref, fbr_ref,
               out0_ref, out1_ref):
        # Blocks: img (Nb,C,HW), flow flat (Nb,2,HW), flow rows (Nb,2H,W),
        #         out (Nb,C+3,HW).
        ff = ff_ref[...]
        fb = fb_ref[...]
        ffx, ffy = ff[:, 0:1, :], ff[:, 1:2, :]          # (Nb,1,HW)
        fbx, fby = fb[:, 0:1, :], fb[:, 1:2, :]

        # Pixel coordinate grid generated in-kernel (no batch dim, hoisted).
        pidx = jax.lax.broadcasted_iota(jnp.int32, (1, 1, HW), 2)
        pidx = pidx.astype(jnp.float32)
        yg = jnp.floor((pidx + 0.5) * (1.0 / W))          # (1,1,HW)
        xg = pidx - yg * W

        # Per-axis source-index iotas (built once, shared by both directions).
        jx = jax.lax.broadcasted_iota(jnp.int32, (W, HW), 0).astype(jnp.float32)
        jy = jax.lax.broadcasted_iota(jnp.int32, (H, HW), 0).astype(jnp.float32)

        def axis_weights(iota2d, coord):
            # coord: (Nb,1,HW) sampling coordinate along this axis.
            # Bilinear weight of source index s at target pixel p.  OOB is
            # folded into the compare: floor(coord) outside [0,S-1] never
            # matches the iota, so the weight is naturally zero.
            c0 = jnp.floor(coord)
            frac = coord - c0
            return (jnp.where(iota2d == c0, 1.0 - frac, 0.0)
                    + jnp.where(iota2d == c0 + 1.0, frac, 0.0))   # (Nb,S,HW)

        def warp(rows, wx, wy):
            # rows: (Nb,2H,W) channel-stacked flow image to be warped.
            # Stage 1 (x-contraction) on the MXU: (2H,W)@(W,HW), batched on Nb.
            tmp = jnp.einsum('nrw,nwp->nrp', rows, wx,
                             preferred_element_type=jnp.float32,
                             precision=jax.lax.Precision.HIGHEST)  # (Nb,2H,HW)
            # Stage 2 (y-contraction) on the VPU: multiply + sublane reduce.
            ox = jnp.sum(tmp[:, 0:H, :] * wy, axis=1, keepdims=True)
            oy = jnp.sum(tmp[:, H:2 * H, :] * wy, axis=1, keepdims=True)
            return ox, oy                                  # each (Nb,1,HW)

        # Warp backward flow at p + ff(p), and forward flow at p + fb(p).
        fbwx, fbwy = warp(fbr_ref[...],
                          axis_weights(jx, xg + ffx),
                          axis_weights(jy, yg + ffy))
        ffwx, ffwy = warp(ffr_ref[...],
                          axis_weights(jx, xg + fbx),
                          axis_weights(jy, yg + fby))

        def occ_mask(fx, fy, gx, gy):
            dx, dy = fx + gx, fy + gy
            d2 = dx * dx + dy * dy
            mag = fx * fx + fy * fy + gx * gx + gy * gy
            return jnp.where(d2 < ALPHA1 * mag + ALPHA2, 1.0, 0.0)

        occ0 = occ_mask(ffx, ffy, fbwx, fbwy)              # (Nb,1,HW)
        occ1 = occ_mask(fbx, fby, ffwx, ffwy)

        # Channel packing: one fused full-block store per output.
        out0_ref[...] = jnp.concatenate(
            [img0_ref[...] * 0.5 + 0.5, ffx * inv_w, ffy * inv_h, occ0], axis=1)
        out1_ref[...] = jnp.concatenate(
            [img1_ref[...] * 0.5 + 0.5, fbx * inv_w, fby * inv_h, occ1], axis=1)

    return kernel


def _flow_occ_pack(img0, img1, flow_fwd, flow_bwd, pairs_per_step=2,
                   vmem_limit_bytes=32 * 1024 * 1024):
    """Per-pair fused pipeline.  img*: (N,C,H,W), flow*: (N,2,H,W) in pixels.
    Returns out0, out1 of shape (N, C+3, H, W)."""
    N, C, H, W = img0.shape
    HW = H * W
    # Keep the grid >= 2 steps where possible so both v7x TensorCores get work.
    target = pairs_per_step if N < 2 else min(pairs_per_step, N // 2)
    nb = _pick_block(N, max(1, target))
    grid = (N // nb,)

    img0_f = img0.astype(jnp.float32).reshape(N, C, HW)
    img1_f = img1.astype(jnp.float32).reshape(N, C, HW)
    ff_flat = flow_fwd.astype(jnp.float32).reshape(N, 2, HW)
    fb_flat = flow_bwd.astype(jnp.float32).reshape(N, 2, HW)
    # Channel-stacked row layout for the warp matmul operand (free reshape).
    ff_rows = flow_fwd.astype(jnp.float32).reshape(N, 2 * H, W)
    fb_rows = flow_bwd.astype(jnp.float32).reshape(N, 2 * H, W)

    kernel = _make_kernel(C, H, W)
    out0, out1 = pl.pallas_call(
        kernel,
        out_shape=(jax.ShapeDtypeStruct((N, C + 3, HW), jnp.float32),
                   jax.ShapeDtypeStruct((N, C + 3, HW), jnp.float32)),
        grid=grid,
        in_specs=[
            pl.BlockSpec((nb, C, HW), lambda b: (b, 0, 0)),      # img0
            pl.BlockSpec((nb, C, HW), lambda b: (b, 0, 0)),      # img1
            pl.BlockSpec((nb, 2, HW), lambda b: (b, 0, 0)),      # flow_fwd flat
            pl.BlockSpec((nb, 2, HW), lambda b: (b, 0, 0)),      # flow_bwd flat
            pl.BlockSpec((nb, 2 * H, W), lambda b: (b, 0, 0)),   # flow_fwd rows
            pl.BlockSpec((nb, 2 * H, W), lambda b: (b, 0, 0)),   # flow_bwd rows
        ],
        out_specs=(
            pl.BlockSpec((nb, C + 3, HW), lambda b: (b, 0, 0)),
            pl.BlockSpec((nb, C + 3, HW), lambda b: (b, 0, 0)),
        ),
        compiler_params=pltpu.CompilerParams(
            dimension_semantics=("parallel",),
            vmem_limit_bytes=vmem_limit_bytes),
    )(img0_f, img1_f, ff_flat, fb_flat, ff_rows, fb_rows)

    return (out0.reshape(N, C + 3, H, W), out1.reshape(N, C + 3, H, W))


# ----------------------------------------------------------------------------
# Module forward (use_existing_flow path)
# ----------------------------------------------------------------------------
def flow_occlusion_processor_forward(img, flows_fwd, flows_bwd, n_pairs=2,
                                     pair_mode='one-to-many'):
    assert pair_mode in ('one-to-many', 'sequential')
    n, v, c, h, w = img.shape
    img = img.astype(jnp.float32)

    if pair_mode == 'one-to-many':
        g = n * v // n_pairs
        imgp = img.reshape(g, n_pairs, c, h, w)
        img0 = jnp.broadcast_to(imgp[:, :1],
                                (g, n_pairs - 1, c, h, w)).reshape(-1, c, h, w)
        img1 = imgp[:, 1:].reshape(-1, c, h, w)
    else:  # sequential
        img0 = img[:, :-1].reshape(-1, c, h, w)
        img1 = img[:, 1:].reshape(-1, c, h, w)

    flow_fwd = flows_fwd.reshape(-1, 2, h, w).astype(jnp.float32)
    flow_bwd = flows_bwd.reshape(-1, 2, h, w).astype(jnp.float32)

    out0, out1 = _flow_occ_pack(img0, img1, flow_fwd, flow_bwd)

    if pair_mode == 'one-to-many':
        img_ip = jnp.stack((out0, out1), axis=1)                 # (N,2,c+3,h,w)
        new_v = v // n_pairs * (n_pairs - 1) * 2
        return img_ip.reshape(n, new_v, c + 3, h, w)

    # sequential: the per-clip padding / flip packing is plain elementwise JAX
    flow0_r = out0[:, c:c + 2].reshape(n, v - 1, 2, h, w)
    flow1_r = out1[:, c:c + 2].reshape(n, v - 1, 2, h, w)
    occ0 = out0[:, c + 2:c + 3].reshape(n, v - 1, 1, h, w)
    occ1 = out1[:, c + 2:c + 3].reshape(n, v - 1, 1, h, w)
    flow0_r = jnp.concatenate([flow0_r, jnp.zeros_like(flow0_r[:, :1])], axis=1)
    flow1_r = jnp.concatenate([jnp.zeros_like(flow1_r[:, :1]), flow1_r], axis=1)
    occ0 = jnp.concatenate([occ0, jnp.ones_like(occ0[:, :1])], axis=1)
    occ1 = jnp.concatenate([jnp.ones_like(occ1[:, :1]), occ1], axis=1)
    img_ip_fwd = jnp.concatenate((img * 0.5 + 0.5, flow0_r, occ0), axis=2)
    img_ip_bwd = jnp.concatenate(
        (jnp.flip(img, axis=1) * 0.5 + 0.5, flow1_r, occ1), axis=2)
    return img_ip_fwd, img_ip_bwd


# ----------------------------------------------------------------------------
# Pure-JAX reference (explicit gather warp) for the correctness check
# ----------------------------------------------------------------------------
def _warp_ref(src, flow):
    """src, flow: (N, 2, H, W); sample src at p + flow(p), zeros padding."""
    N, _, H, W = src.shape
    yg, xg = jnp.meshgrid(jnp.arange(H, dtype=jnp.float32),
                          jnp.arange(W, dtype=jnp.float32), indexing='ij')
    sx = xg[None] + flow[:, 0]
    sy = yg[None] + flow[:, 1]
    x0 = jnp.floor(sx)
    y0 = jnp.floor(sy)
    wx = sx - x0
    wy = sy - y0
    n_idx = jnp.arange(N)[:, None, None, None]
    c_idx = jnp.arange(2)[None, :, None, None]
    out = jnp.zeros_like(src)
    for dx, dy in ((0, 0), (1, 0), (0, 1), (1, 1)):
        cx = x0 + dx
        cy = y0 + dy
        wgt = (wx if dx else 1.0 - wx) * (wy if dy else 1.0 - wy)
        valid = (cx >= 0) & (cx <= W - 1) & (cy >= 0) & (cy <= H - 1)
        cxc = jnp.clip(cx, 0, W - 1).astype(jnp.int32)
        cyc = jnp.clip(cy, 0, H - 1).astype(jnp.int32)
        vals = src[n_idx, c_idx, cyc[:, None], cxc[:, None]]
        out = out + jnp.where(valid, wgt, 0.0)[:, None] * vals
    return out


def _reference_one_to_many(img, flows_fwd, flows_bwd, n_pairs):
    n, v, c, h, w = img.shape
    g = n * v // n_pairs
    imgp = img.reshape(g, n_pairs, c, h, w)
    img0 = jnp.broadcast_to(imgp[:, :1],
                            (g, n_pairs - 1, c, h, w)).reshape(-1, c, h, w)
    img1 = imgp[:, 1:].reshape(-1, c, h, w)
    ff = flows_fwd.reshape(-1, 2, h, w)
    fb = flows_bwd.reshape(-1, 2, h, w)
    fb_w = _warp_ref(fb, ff)
    ff_w = _warp_ref(ff, fb)

    def occ(f, fw):
        d2 = jnp.sum((f + fw) ** 2, axis=1, keepdims=True)
        mag = jnp.sum(f * f + fw * fw, axis=1, keepdims=True)
        return jnp.where(d2 < ALPHA1 * mag + ALPHA2, 1.0, 0.0)

    occ0, occ1 = occ(ff, fb_w), occ(fb, ff_w)
    f0r = jnp.concatenate([ff[:, :1] * 2 / w, ff[:, 1:2] * 2 / h], axis=1)
    f1r = jnp.concatenate([fb[:, :1] * 2 / w, fb[:, 1:2] * 2 / h], axis=1)
    flow = jnp.stack((f0r, f1r), axis=1)
    occ_s = jnp.stack((occ0, occ1), axis=1)
    img_pair = jnp.stack((img0, img1), axis=1)
    img_ip = jnp.concatenate((img_pair * 0.5 + 0.5, flow, occ_s), axis=2)
    new_v = v // n_pairs * (n_pairs - 1) * 2
    return img_ip.reshape(n, new_v, -1, h, w)


if __name__ == "__main__":
    n, v, c, h, w = 2, 4, 3, 16, 16
    n_pairs = 2

    key = jax.random.PRNGKey(0)
    k_img, k_base, k_n1, k_n2, k_seq = jax.random.split(key, 5)

    img = jax.random.normal(k_img, (n, v, c, h, w), dtype=jnp.float32)

    # Mostly-consistent forward/backward flows (fwd ~ -bwd) so the occlusion
    # mask has a mix of 0s (image borders / noisy pixels) and 1s.
    N = n * v // n_pairs * (n_pairs - 1)
    base = jax.random.uniform(k_base, (N, 2, 1, 1), minval=-3.0, maxval=3.0)
    flows_fwd = (base + 0.1 * jax.random.normal(k_n1, (N, 2, h, w))
                 ).astype(jnp.float32)
    flows_bwd = (-base + 0.1 * jax.random.normal(k_n2, (N, 2, h, w))
                 ).astype(jnp.float32)

    out = flow_occlusion_processor_forward(img, flows_fwd, flows_bwd,
                                           n_pairs=n_pairs,
                                           pair_mode='one-to-many')
    out = jax.block_until_ready(out)
    new_v = v // n_pairs * (n_pairs - 1) * 2
    assert out.shape == (n, new_v, c + 3, h, w), out.shape

    ref = _reference_one_to_many(img, flows_fwd, flows_bwd, n_pairs)
    cont_err = jnp.max(jnp.abs(out[:, :, :c + 2] - ref[:, :, :c + 2]))
    assert cont_err < 1e-4, float(cont_err)
    # Hard 0/1 mask channel: allow a handful of threshold-boundary flips.
    occ_err = jnp.mean(jnp.abs(out[:, :, c + 2:] - ref[:, :, c + 2:]))
    assert occ_err < 5e-3, float(occ_err)

    # sequential pair mode: exercise and shape-check
    Ns = n * (v - 1)
    ffs = (0.5 * jax.random.normal(k_seq, (Ns, 2, h, w))).astype(jnp.float32)
    fbs = -ffs
    ip_fwd, ip_bwd = flow_occlusion_processor_forward(
        img, ffs, fbs, n_pairs=n_pairs, pair_mode='sequential')
    ip_fwd = jax.block_until_ready(ip_fwd)
    ip_bwd = jax.block_until_ready(ip_bwd)
    assert ip_fwd.shape == (n, v, c + 3, h, w), ip_fwd.shape
    assert ip_bwd.shape == (n, v, c + 3, h, w), ip_bwd.shape

    print("KERNEL_OK")
</pallas_src>

<mosaic_0001>
module attributes {stable_mosaic.version = 11 : i64} {
  func.func @kernel(%arg0: i32, %arg1: memref<2x3x256xf32, #tpu.memory_space<vmem>>, %arg2: memref<2x3x256xf32, #tpu.memory_space<vmem>>, %arg3: memref<2x2x256xf32, #tpu.memory_space<vmem>>, %arg4: memref<2x2x256xf32, #tpu.memory_space<vmem>>, %arg5: memref<2x32x16xf32, #tpu.memory_space<vmem>>, %arg6: memref<2x32x16xf32, #tpu.memory_space<vmem>>, %arg7: memref<2x6x256xf32, #tpu.memory_space<vmem>>, %arg8: memref<2x6x256xf32, #tpu.memory_space<vmem>>) attributes {dimension_semantics = [#tpu.dimension_semantics<parallel>], iteration_bounds = array<i64: 2>, scalar_prefetch = 0 : i64, scratch_operands = 0 : i64, tpu.core_type = #tpu.core_type<tc>, window_params = [{transform_indices = @transform_0, window_bounds = array<i64: 2, 3, 256>}, {transform_indices = @transform_1, window_bounds = array<i64: 2, 3, 256>}, {transform_indices = @transform_2, window_bounds = array<i64: 2, 2, 256>}, {transform_indices = @transform_3, window_bounds = array<i64: 2, 2, 256>}, {transform_indices = @transform_4, window_bounds = array<i64: 2, 32, 16>}, {transform_indices = @transform_5, window_bounds = array<i64: 2, 32, 16>}, {transform_indices = @transform_6, window_bounds = array<i64: 2, 6, 256>}, {transform_indices = @transform_7, window_bounds = array<i64: 2, 6, 256>}]} {
    %c0 = arith.constant 0 : index
    %c0_0 = arith.constant 0 : index
    %c0_1 = arith.constant 0 : index
    %0 = vector.load %arg3[%c0, %c0_0, %c0_1] : memref<2x2x256xf32, #tpu.memory_space<vmem>>, vector<2x2x256xf32>
    %c0_2 = arith.constant 0 : index
    %c0_3 = arith.constant 0 : index
    %c0_4 = arith.constant 0 : index
    %1 = vector.load %arg4[%c0_2, %c0_3, %c0_4] : memref<2x2x256xf32, #tpu.memory_space<vmem>>, vector<2x2x256xf32>
    %2 = vector.extract_strided_slice %0 {offsets = [0, 0, 0], sizes = [2, 1, 256], strides = [1, 1, 1]} : vector<2x2x256xf32> to vector<2x1x256xf32>
    %3 = vector.extract_strided_slice %0 {offsets = [0, 1, 0], sizes = [2, 1, 256], strides = [1, 1, 1]} : vector<2x2x256xf32> to vector<2x1x256xf32>
    %4 = vector.extract_strided_slice %1 {offsets = [0, 0, 0], sizes = [2, 1, 256], strides = [1, 1, 1]} : vector<2x2x256xf32> to vector<2x1x256xf32>
    %5 = vector.extract_strided_slice %1 {offsets = [0, 1, 0], sizes = [2, 1, 256], strides = [1, 1, 1]} : vector<2x2x256xf32> to vector<2x1x256xf32>
    %6 = tpu.iota {dimensions = array<i32: 2>} : vector<1x1x256xi32>
    %7 = arith.sitofp %6 : vector<1x1x256xi32> to vector<1x1x256xf32>
    %cst = arith.constant 5.000000e-01 : f32
    %8 = vector.broadcast %cst : f32 to vector<1x1x256xf32>
    %9 = arith.addf %7, %8 : vector<1x1x256xf32>
    %cst_5 = arith.constant 6.250000e-02 : f32
    %10 = vector.broadcast %cst_5 : f32 to vector<1x1x256xf32>
    %11 = arith.mulf %9, %10 : vector<1x1x256xf32>
    %12 = math.floor %11 : vector<1x1x256xf32>
    %cst_6 = arith.constant 1.600000e+01 : f32
    %13 = vector.broadcast %cst_6 : f32 to vector<1x1x256xf32>
    %14 = arith.mulf %12, %13 : vector<1x1x256xf32>
    %15 = arith.subf %7, %14 : vector<1x1x256xf32>
    %16 = tpu.iota {dimensions = array<i32: 0>} : vector<16x256xi32>
    %17 = arith.sitofp %16 : vector<16x256xi32> to vector<16x256xf32>
    %18 = tpu.iota {dimensions = array<i32: 0>} : vector<16x256xi32>
    %19 = arith.sitofp %18 : vector<16x256xi32> to vector<16x256xf32>
    %c0_7 = arith.constant 0 : index
    %c0_8 = arith.constant 0 : index
    %c0_9 = arith.constant 0 : index
    %20 = vector.load %arg6[%c0_7, %c0_8, %c0_9] : memref<2x32x16xf32, #tpu.memory_space<vmem>>, vector<2x32x16xf32>
    %21 = vector.broadcast %15 : vector<1x1x256xf32> to vector<2x1x256xf32>
    %22 = arith.addf %21, %2 : vector<2x1x256xf32>
    %23 = math.floor %22 : vector<2x1x256xf32>
    %24 = arith.subf %22, %23 : vector<2x1x256xf32>
    %25 = vector.shape_cast %17 : vector<16x256xf32> to vector<1x16x256xf32>
    %26 = vector.broadcast %25 : vector<1x16x256xf32> to vector<2x16x256xf32>
    %27 = vector.broadcast %23 : vector<2x1x256xf32> to vector<2x16x256xf32>
    %28 = arith.cmpf oeq, %26, %27 : vector<2x16x256xf32>
    %cst_10 = arith.constant 1.000000e+00 : f32
    %29 = vector.broadcast %cst_10 : f32 to vector<2x1x256xf32>
    %30 = arith.subf %29, %24 : vector<2x1x256xf32>
    %cst_11 = arith.constant 0.000000e+00 : f32
    %31 = vector.shape_cast %30 : vector<2x1x256xf32> to vector<2x1x256xf32>
    %32 = vector.broadcast %31 : vector<2x1x256xf32> to vector<2x16x256xf32>
    %33 = vector.broadcast %cst_11 : f32 to vector<2x16x256xf32>
    %34 = arith.select %28, %32, %33 : vector<2x16x256xi1>, vector<2x16x256xf32>
    %cst_12 = arith.constant 1.000000e+00 : f32
    %35 = vector.broadcast %cst_12 : f32 to vector<2x1x256xf32>
    %36 = arith.addf %23, %35 : vector<2x1x256xf32>
    %37 = vector.shape_cast %17 : vector<16x256xf32> to vector<1x16x256xf32>
    %38 = vector.broadcast %37 : vector<1x16x256xf32> to vector<2x16x256xf32>
    %39 = vector.broadcast %36 : vector<2x1x256xf32> to vector<2x16x256xf32>
    %40 = arith.cmpf oeq, %38, %39 : vector<2x16x256xf32>
    %cst_13 = arith.constant 0.000000e+00 : f32
    %41 = vector.shape_cast %24 : vector<2x1x256xf32> to vector<2x1x256xf32>
    %42 = vector.broadcast %41 : vector<2x1x256xf32> to vector<2x16x256xf32>
    %43 = vector.broadcast %cst_13 : f32 to vector<2x16x256xf32>
    %44 = arith.select %40, %42, %43 : vector<2x16x256xi1>, vector<2x16x256xf32>
    %45 = arith.addf %34, %44 : vector<2x16x256xf32>
    %46 = vector.broadcast %12 : vector<1x1x256xf32> to vector<2x1x256xf32>
    %47 = arith.addf %46, %3 : vector<2x1x256xf32>
    %48 = math.floor %47 : vector<2x1x256xf32>
    %49 = arith.subf %47, %48 : vector<2x1x256xf32>
    %50 = vector.shape_cast %19 : vector<16x256xf32> to vector<1x16x256xf32>
    %51 = vector.broadcast %50 : vector<1x16x256xf32> to vector<2x16x256xf32>
    %52 = vector.broadcast %48 : vector<2x1x256xf32> to vector<2x16x256xf32>
    %53 = arith.cmpf oeq, %51, %52 : vector<2x16x256xf32>
    %cst_14 = arith.constant 1.000000e+00 : f32
    %54 = vector.broadcast %cst_14 : f32 to vector<2x1x256xf32>
    %55 = arith.subf %54, %49 : vector<2x1x256xf32>
    %cst_15 = arith.constant 0.000000e+00 : f32
    %56 = vector.shape_cast %55 : vector<2x1x256xf32> to vector<2x1x256xf32>
    %57 = vector.broadcast %56 : vector<2x1x256xf32> to vector<2x16x256xf32>
    %58 = vector.broadcast %cst_15 : f32 to vector<2x16x256xf32>
    %59 = arith.select %53, %57, %58 : vector<2x16x256xi1>, vector<2x16x256xf32>
    %cst_16 = arith.constant 1.000000e+00 : f32
    %60 = vector.broadcast %cst_16 : f32 to vector<2x1x256xf32>
    %61 = arith.addf %48, %60 : vector<2x1x256xf32>
    %62 = vector.shape_cast %19 : vector<16x256xf32> to vector<1x16x256xf32>
    %63 = vector.broadcast %62 : vector<1x16x256xf32> to vector<2x16x256xf32>
    %64 = vector.broadcast %61 : vector<2x1x256xf32> to vector<2x16x256xf32>
    %65 = arith.cmpf oeq, %63, %64 : vector<2x16x256xf32>
    %cst_17 = arith.constant 0.000000e+00 : f32
    %66 = vector.shape_cast %49 : vector<2x1x256xf32> to vector<2x1x256xf32>
    %67 = vector.broadcast %66 : vector<2x1x256xf32> to vector<2x16x256xf32>
    %68 = vector.broadcast %cst_17 : f32 to vector<2x16x256xf32>
    %69 = arith.select %65, %67, %68 : vector<2x16x256xi1>, vector<2x16x256xf32>
    %70 = arith.addf %59, %69 : vector<2x16x256xf32>
    "tpu.trace_start"() <{level = 10 : i32, message = "nrw,nwp->nrp"}> : () -> ()
    %cst_18 = arith.constant dense<0.000000e+00> : vector<2x32x256xf32>
    %71 = tpu.matmul %20, %45, %cst_18 {dimension_numbers = #tpu.dot_dimension_numbers<[2], [1], [1], [2], [0, 0, 0, 1, 1, 2], [0], [0]>, precision = #tpu.contract_precision<fp32>} : vector<2x32x16xf32>, vector<2x16x256xf32>, vector<2x32x256xf32> -> vector<2x32x256xf32>
    "tpu.trace_stop"() : () -> ()
    %72 = vector.extract_strided_slice %71 {offsets = [0, 0, 0], sizes = [2, 16, 256], strides = [1, 1, 1]} : vector<2x32x256xf32> to vector<2x16x256xf32>
    %73 = arith.mulf %72, %70 : vector<2x16x256xf32>
    %cst_19 = arith.constant dense<0.000000e+00> : vector<2x256xf32>
    %74 = vector.multi_reduction <add>, %73, %cst_19 [1] : vector<2x16x256xf32> to vector<2x256xf32>
    %75 = vector.shape_cast %74 : vector<2x256xf32> to vector<2x1x256xf32>
    %76 = vector.extract_strided_slice %71 {offsets = [0, 16, 0], sizes = [2, 16, 256], strides = [1, 1, 1]} : vector<2x32x256xf32> to vector<2x16x256xf32>
    %77 = arith.mulf %76, %70 : vector<2x16x256xf32>
    %cst_20 = arith.constant dense<0.000000e+00> : vector<2x256xf32>
    %78 = vector.multi_reduction <add>, %77, %cst_20 [1] : vector<2x16x256xf32> to vector<2x256xf32>
    %79 = vector.shape_cast %78 : vector<2x256xf32> to vector<2x1x256xf32>
    %c0_21 = arith.constant 0 : index
    %c0_22 = arith.constant 0 : index
    %c0_23 = arith.constant 0 : index
    %80 = vector.load %arg5[%c0_21, %c0_22, %c0_23] : memref<2x32x16xf32, #tpu.memory_space<vmem>>, vector<2x32x16xf32>
    %81 = vector.broadcast %15 : vector<1x1x256xf32> to vector<2x1x256xf32>
    %82 = arith.addf %81, %4 : vector<2x1x256xf32>
    %83 = math.floor %82 : vector<2x1x256xf32>
    %84 = arith.subf %82, %83 : vector<2x1x256xf32>
    %85 = vector.shape_cast %17 : vector<16x256xf32> to vector<1x16x256xf32>
    %86 = vector.broadcast %85 : vector<1x16x256xf32> to vector<2x16x256xf32>
    %87 = vector.broadcast %83 : vector<2x1x256xf32> to vector<2x16x256xf32>
    %88 = arith.cmpf oeq, %86, %87 : vector<2x16x256xf32>
    %cst_24 = arith.constant 1.000000e+00 : f32
    %89 = vector.broadcast %cst_24 : f32 to vector<2x1x256xf32>
    %90 = arith.subf %89, %84 : vector<2x1x256xf32>
    %cst_25 = arith.constant 0.000000e+00 : f32
    %91 = vector.shape_cast %90 : vector<2x1x256xf32> to vector<2x1x256xf32>
    %92 = vector.broadcast %91 : vector<2x1x256xf32> to vector<2x16x256xf32>
    %93 = vector.broadcast %cst_25 : f32 to vector<2x16x256xf32>
    %94 = arith.select %88, %92, %93 : vector<2x16x256xi1>, vector<2x16x256xf32>
    %cst_26 = arith.constant 1.000000e+00 : f32
    %95 = vector.broadcast %cst_26 : f32 to vector<2x1x256xf32>
    %96 = arith.addf %83, %95 : vector<2x1x256xf32>
    %97 = vector.shape_cast %17 : vector<16x256xf32> to vector<1x16x256xf32>
    %98 = vector.broadcast %97 : vector<1x16x256xf32> to vector<2x16x256xf32>
    %99 = vector.broadcast %96 : vector<2x1x256xf32> to vector<2x16x256xf32>
    %100 = arith.cmpf oeq, %98, %99 : vector<2x16x256xf32>
    %cst_27 = arith.constant 0.000000e+00 : f32
    %101 = vector.shape_cast %84 : vector<2x1x256xf32> to vector<2x1x256xf32>
    %102 = vector.broadcast %101 : vector<2x1x256xf32> to vector<2x16x256xf32>
    %103 = vector.broadcast %cst_27 : f32 to vector<2x16x256xf32>
    %104 = arith.select %100, %102, %103 : vector<2x16x256xi1>, vector<2x16x256xf32>
    %105 = arith.addf %94, %104 : vector<2x16x256xf32>
    %106 = vector.broadcast %12 : vector<1x1x256xf32> to vector<2x1x256xf32>
    %107 = arith.addf %106, %5 : vector<2x1x256xf32>
    %108 = math.floor %107 : vector<2x1x256xf32>
    %109 = arith.subf %107, %108 : vector<2x1x256xf32>
    %110 = vector.shape_cast %19 : vector<16x256xf32> to vector<1x16x256xf32>
    %111 = vector.broadcast %110 : vector<1x16x256xf32> to vector<2x16x256xf32>
    %112 = vector.broadcast %108 : vector<2x1x256xf32> to vector<2x16x256xf32>
    %113 = arith.cmpf oeq, %111, %112 : vector<2x16x256xf32>
    %cst_28 = arith.constant 1.000000e+00 : f32
    %114 = vector.broadcast %cst_28 : f32 to vector<2x1x256xf32>
    %115 = arith.subf %114, %109 : vector<2x1x256xf32>
    %cst_29 = arith.constant 0.000000e+00 : f32
    %116 = vector.shape_cast %115 : vector<2x1x256xf32> to vector<2x1x256xf32>
    %117 = vector.broadcast %116 : vector<2x1x256xf32> to vector<2x16x256xf32>
    %118 = vector.broadcast %cst_29 : f32 to vector<2x16x256xf32>
    %119 = arith.select %113, %117, %118 : vector<2x16x256xi1>, vector<2x16x256xf32>
    %cst_30 = arith.constant 1.000000e+00 : f32
    %120 = vector.broadcast %cst_30 : f32 to vector<2x1x256xf32>
    %121 = arith.addf %108, %120 : vector<2x1x256xf32>
    %122 = vector.shape_cast %19 : vector<16x256xf32> to vector<1x16x256xf32>
    %123 = vector.broadcast %122 : vector<1x16x256xf32> to vector<2x16x256xf32>
    %124 = vector.broadcast %121 : vector<2x1x256xf32> to vector<2x16x256xf32>
    %125 = arith.cmpf oeq, %123, %124 : vector<2x16x256xf32>
    %cst_31 = arith.constant 0.000000e+00 : f32
    %126 = vector.shape_cast %109 : vector<2x1x256xf32> to vector<2x1x256xf32>
    %127 = vector.broadcast %126 : vector<2x1x256xf32> to vector<2x16x256xf32>
    %128 = vector.broadcast %cst_31 : f32 to vector<2x16x256xf32>
    %129 = arith.select %125, %127, %128 : vector<2x16x256xi1>, vector<2x16x256xf32>
    %130 = arith.addf %119, %129 : vector<2x16x256xf32>
    "tpu.trace_start"() <{level = 10 : i32, message = "nrw,nwp->nrp"}> : () -> ()
    %cst_32 = arith.constant dense<0.000000e+00> : vector<2x32x256xf32>
    %131 = tpu.matmul %80, %105, %cst_32 {dimension_numbers = #tpu.dot_dimension_numbers<[2], [1], [1], [2], [0, 0, 0, 1, 1, 2], [0], [0]>, precision = #tpu.contract_precision<fp32>} : vector<2x32x16xf32>, vector<2x16x256xf32>, vector<2x32x256xf32> -> vector<2x32x256xf32>
    "tpu.trace_stop"() : () -> ()
    %132 = vector.extract_strided_slice %131 {offsets = [0, 0, 0], sizes = [2, 16, 256], strides = [1, 1, 1]} : vector<2x32x256xf32> to vector<2x16x256xf32>
    %133 = arith.mulf %132, %130 : vector<2x16x256xf32>
    %cst_33 = arith.constant dense<0.000000e+00> : vector<2x256xf32>
    %134 = vector.multi_reduction <add>, %133, %cst_33 [1] : vector<2x16x256xf32> to vector<2x256xf32>
    %135 = vector.shape_cast %134 : vector<2x256xf32> to vector<2x1x256xf32>
    %136 = vector.extract_strided_slice %131 {offsets = [0, 16, 0], sizes = [2, 16, 256], strides = [1, 1, 1]} : vector<2x32x256xf32> to vector<2x16x256xf32>
    %137 = arith.mulf %136, %130 : vector<2x16x256xf32>
    %cst_34 = arith.constant dense<0.000000e+00> : vector<2x256xf32>
    %138 = vector.multi_reduction <add>, %137, %cst_34 [1] : vector<2x16x256xf32> to vector<2x256xf32>
    %139 = vector.shape_cast %138 : vector<2x256xf32> to vector<2x1x256xf32>
    %140 = arith.addf %2, %75 : vector<2x1x256xf32>
    %141 = arith.addf %3, %79 : vector<2x1x256xf32>
    %142 = arith.mulf %140, %140 : vector<2x1x256xf32>
    %143 = arith.mulf %141, %141 : vector<2x1x256xf32>
    %144 = arith.addf %142, %143 : vector<2x1x256xf32>
    %145 = arith.mulf %2, %2 : vector<2x1x256xf32>
    %146 = arith.mulf %3, %3 : vector<2x1x256xf32>
    %147 = arith.addf %145, %146 : vector<2x1x256xf32>
    %148 = arith.mulf %75, %75 : vector<2x1x256xf32>
    %149 = arith.addf %147, %148 : vector<2x1x256xf32>
    %150 = arith.mulf %79, %79 : vector<2x1x256xf32>
    %151 = arith.addf %149, %150 : vector<2x1x256xf32>
    %cst_35 = arith.constant 0.00999999977 : f32
    %152 = vector.broadcast %cst_35 : f32 to vector<2x1x256xf32>
    %153 = arith.mulf %152, %151 : vector<2x1x256xf32>
    %cst_36 = arith.constant 5.000000e-01 : f32
    %154 = vector.broadcast %cst_36 : f32 to vector<2x1x256xf32>
    %155 = arith.addf %153, %154 : vector<2x1x256xf32>
    %156 = arith.cmpf olt, %144, %155 : vector<2x1x256xf32>
    %cst_37 = arith.constant 1.000000e+00 : f32
    %cst_38 = arith.constant 0.000000e+00 : f32
    %157 = vector.broadcast %cst_37 : f32 to vector<2x1x256xf32>
    %158 = vector.broadcast %cst_38 : f32 to vector<2x1x256xf32>
    %159 = arith.select %156, %157, %158 : vector<2x1x256xi1>, vector<2x1x256xf32>
    %160 = arith.addf %4, %135 : vector<2x1x256xf32>
    %161 = arith.addf %5, %139 : vector<2x1x256xf32>
    %162 = arith.mulf %160, %160 : vector<2x1x256xf32>
    %163 = arith.mulf %161, %161 : vector<2x1x256xf32>
    %164 = arith.addf %162, %163 : vector<2x1x256xf32>
    %165 = arith.mulf %4, %4 : vector<2x1x256xf32>
    %166 = arith.mulf %5, %5 : vector<2x1x256xf32>
    %167 = arith.addf %165, %166 : vector<2x1x256xf32>
    %168 = arith.mulf %135, %135 : vector<2x1x256xf32>
    %169 = arith.addf %167, %168 : vector<2x1x256xf32>
    %170 = arith.mulf %139, %139 : vector<2x1x256xf32>
    %171 = arith.addf %169, %170 : vector<2x1x256xf32>
    %cst_39 = arith.constant 0.00999999977 : f32
    %172 = vector.broadcast %cst_39 : f32 to vector<2x1x256xf32>
    %173 = arith.mulf %172, %171 : vector<2x1x256xf32>
    %cst_40 = arith.constant 5.000000e-01 : f32
    %174 = vector.broadcast %cst_40 : f32 to vector<2x1x256xf32>
    %175 = arith.addf %173, %174 : vector<2x1x256xf32>
    %176 = arith.cmpf olt, %164, %175 : vector<2x1x256xf32>
    %cst_41 = arith.constant 1.000000e+00 : f32
    %cst_42 = arith.constant 0.000000e+00 : f32
    %177 = vector.broadcast %cst_41 : f32 to vector<2x1x256xf32>
    %178 = vector.broadcast %cst_42 : f32 to vector<2x1x256xf32>
    %179 = arith.select %176, %177, %178 : vector<2x1x256xi1>, vector<2x1x256xf32>
    %c0_43 = arith.constant 0 : index
    %c0_44 = arith.constant 0 : index
    %c0_45 = arith.constant 0 : index
    %180 = vector.load %arg1[%c0_43, %c0_44, %c0_45] : memref<2x3x256xf32, #tpu.memory_space<vmem>>, vector<2x3x256xf32>
    %cst_46 = arith.constant 5.000000e-01 : f32
    %181 = vector.broadcast %cst_46 : f32 to vector<2x3x256xf32>
    %182 = arith.mulf %180, %181 : vector<2x3x256xf32>
    %cst_47 = arith.constant 5.000000e-01 : f32
    %183 = vector.broadcast %cst_47 : f32 to vector<2x3x256xf32>
    %184 = arith.addf %182, %183 : vector<2x3x256xf32>
    %cst_48 = arith.constant 1.250000e-01 : f32
    %185 = vector.broadcast %cst_48 : f32 to vector<2x1x256xf32>
    %186 = arith.mulf %2, %185 : vector<2x1x256xf32>
    %cst_49 = arith.constant 1.250000e-01 : f32
    %187 = vector.broadcast %cst_49 : f32 to vector<2x1x256xf32>
    %188 = arith.mulf %3, %187 : vector<2x1x256xf32>
    %189 = tpu.concatenate %184, %186, %188, %159 in 1 : vector<2x3x256xf32>, vector<2x1x256xf32>, vector<2x1x256xf32>, vector<2x1x256xf32> -> vector<2x6x256xf32>
    %c0_50 = arith.constant 0 : index
    %c0_51 = arith.constant 0 : index
    %c0_52 = arith.constant 0 : index
    %190 = vector.load %arg7[%c0_50, %c0_51, %c0_52] : memref<2x6x256xf32, #tpu.memory_space<vmem>>, vector<2x6x256xf32>
    tpu.vector_store %arg7[%c0_50, %c0_51, %c0_52], %189 {strides = array<i32>} : memref<2x6x256xf32, #tpu.memory_space<vmem>>, vector<2x6x256xf32>,
    %c0_53 = arith.constant 0 : index
    %c0_54 = arith.constant 0 : index
    %c0_55 = arith.constant 0 : index
    %191 = vector.load %arg2[%c0_53, %c0_54, %c0_55] : memref<2x3x256xf32, #tpu.memory_space<vmem>>, vector<2x3x256xf32>
    %cst_56 = arith.constant 5.000000e-01 : f32
    %192 = vector.broadcast %cst_56 : f32 to vector<2x3x256xf32>
    %193 = arith.mulf %191, %192 : vector<2x3x256xf32>
    %cst_57 = arith.constant 5.000000e-01 : f32
    %194 = vector.broadcast %cst_57 : f32 to vector<2x3x256xf32>
    %195 = arith.addf %193, %194 : vector<2x3x256xf32>
    %cst_58 = arith.constant 1.250000e-01 : f32
    %196 = vector.broadcast %cst_58 : f32 to vector<2x1x256xf32>
    %197 = arith.mulf %4, %196 : vector<2x1x256xf32>
    %cst_59 = arith.constant 1.250000e-01 : f32
    %198 = vector.broadcast %cst_59 : f32 to vector<2x1x256xf32>
    %199 = arith.mulf %5, %198 : vector<2x1x256xf32>
    %200 = tpu.concatenate %195, %197, %199, %179 in 1 : vector<2x3x256xf32>, vector<2x1x256xf32>, vector<2x1x256xf32>, vector<2x1x256xf32> -> vector<2x6x256xf32>
    %c0_60 = arith.constant 0 : index
    %c0_61 = arith.constant 0 : index
    %c0_62 = arith.constant 0 : index
    %201 = vector.load %arg8[%c0_60, %c0_61, %c0_62] : memref<2x6x256xf32, #tpu.memory_space<vmem>>, vector<2x6x256xf32>
    tpu.vector_store %arg8[%c0_60, %c0_61, %c0_62], %200 {strides = array<i32>} : memref<2x6x256xf32, #tpu.memory_space<vmem>>, vector<2x6x256xf32>,
    return
  }
  func.func @transform_0(%arg0: i32) -> (i32, i32, i32) {
    %c0_i32 = arith.constant 0 : i32
    %c0_i32_0 = arith.constant 0 : i32
    %c0_i32_1 = arith.constant 0 : i32
    return %arg0, %c0_i32, %c0_i32_0 : i32, i32, i32
  }
  func.func @transform_1(%arg0: i32) -> (i32, i32, i32) {
    %c0_i32 = arith.constant 0 : i32
    %c0_i32_0 = arith.constant 0 : i32
    %c0_i32_1 = arith.constant 0 : i32
    return %arg0, %c0_i32, %c0_i32_0 : i32, i32, i32
  }
  func.func @transform_2(%arg0: i32) -> (i32, i32, i32) {
    %c0_i32 = arith.constant 0 : i32
    %c0_i32_0 = arith.constant 0 : i32
    %c0_i32_1 = arith.constant 0 : i32
    return %arg0, %c0_i32, %c0_i32_0 : i32, i32, i32
  }
  func.func @transform_3(%arg0: i32) -> (i32, i32, i32) {
    %c0_i32 = arith.constant 0 : i32
    %c0_i32_0 = arith.constant 0 : i32
    %c0_i32_1 = arith.constant 0 : i32
    return %arg0, %c0_i32, %c0_i32_0 : i32, i32, i32
  }
  func.func @transform_4(%arg0: i32) -> (i32, i32, i32) {
    %c0_i32 = arith.constant 0 : i32
    %c0_i32_0 = arith.constant 0 : i32
    %c0_i32_1 = arith.constant 0 : i32
    return %arg0, %c0_i32, %c0_i32_0 : i32, i32, i32
  }
  func.func @transform_5(%arg0: i32) -> (i32, i32, i32) {
    %c0_i32 = arith.constant 0 : i32
    %c0_i32_0 = arith.constant 0 : i32
    %c0_i32_1 = arith.constant 0 : i32
    return %arg0, %c0_i32, %c0_i32_0 : i32, i32, i32
  }
  func.func @transform_6(%arg0: i32) -> (i32, i32, i32) {
    %c0_i32 = arith.constant 0 : i32
    %c0_i32_0 = arith.constant 0 : i32
    %c0_i32_1 = arith.constant 0 : i32
    return %arg0, %c0_i32, %c0_i32_0 : i32, i32, i32
  }
  func.func @transform_7(%arg0: i32) -> (i32, i32, i32) {
    %c0_i32 = arith.constant 0 : i32
    %c0_i32_0 = arith.constant 0 : i32
    %c0_i32_1 = arith.constant 0 : i32
    return %arg0, %c0_i32, %c0_i32_0 : i32, i32, i32
  }
}

</mosaic_0001>

<bundles_post_ra>
// kernel: tpu_custom_call.1
= control target key start
LH: loop header
LB: loop body
LE: loop exit
PB: predicated region body
PF: predicated region fallthrough
CT: control target
= control target key end

     0   :  { %s3598_s24 = smov 0   ;;  %s4643_s0 = inlined_call_operand.vmem [shape: f32[4,3,256], index: 0, kind: input, shape index: {}]   ;;  %s4644_s1 = inlined_call_operand.vmem [shape: f32[4,3,256], index: 1, kind: input, shape index: {}]   ;;  %s4645_s2 = inlined_call_operand.vmem [shape: f32[4,2,256], index: 2, kind: input, shape index: {}]   ;;  %s4646_s3 = inlined_call_operand.vmem [shape: f32[4,2,256], index: 3, kind: input, shape index: {}]   ;;  %s4647_s4 = inlined_call_operand.vmem [shape: f32[4,32,16], index: 4, kind: input, shape index: {}]   ;;  %s4648_s5 = inlined_call_operand.vmem [shape: f32[4,32,16], index: 5, kind: input, shape index: {}]   ;;  %s4649_s6 = inlined_call_operand.vmem [shape: f32[4,6,256], index: 6, kind: output, shape index: {0}]   ;;  %s4650_s7 = inlined_call_operand.vmem [shape: f32[4,6,256], index: 7, kind: output, shape index: {1}]  }
   0x1 LB: > { %s3489_s25 = sadd.s32 4294967295, %s3555_s24   ;;  %p3493_p0 = scmp.ge.s32.totalorder %s3555_s24, 1  ;;  %s3555_s24 = sphi %s3598_s24, %s18_s24  }
   0x2   : > { %p302_p1 = scmp.lt.s32.totalorder %s3555_s24, 3 }
   0x4   : > { %p303_p2 = pnand %p3493_p0, %p302_p1 }
   0x5   : > { %s3494_s26 = sshll.u32 (!%p303_p2), %s3489_s25, 1 }
   0x6   : > { %306 = sbr.rel (%p303_p2) target bundleno = 598 (0x256), region = 44  ;;  %p373_p3 = scmp.lt.s32.totalorder (!%p303_p2), %s3494_s26, 3 }
   0xb   : > { %v432_v0 = vlaneseq  ;;  %s4692_s26 = smov (!%p373_p3, %s3494_s26), 3  ;;  %vm630_vm0 = vcmask 130048  }
   0xc   : > { %s3530_s27 = sshll.u32 %s4692_s26, 2  ;;  %s3532_s28 = sshll.u32 %s4692_s26, 5 }
   0xd   : > { %v433_v1 = vand.u32 127, %v432_v0  ;;  %s3615_s8 = scalar_lea.vmem %s4645_s2, %s3530_s27  ;;  %s3622_s11 = scalar_lea.vmem %s4648_s5, %s3532_s28  ;;  %v448_v10 = vshrl.u32 %v432_v0, 7 }
   0xe   : > { %v452_v7 = vld [vmem:[%s3622_s11] sm:$0xff]  ;;  %v453_v15 = vld [vmem:[%s3622_s11 + $0x8] sm:$0xff]  ;;  %v454_v31 = vld [vmem:[%s3622_s11 + $0x10] sm:$0xff]  ;;  %s3851_s14 = scalar_lea.vmem %s4646_s3, %s3530_s27  ;;  %s3898_s17 = scalar_lea.vmem %s4647_s4, %s3532_s28 }
   0xf   : > { %v435_v2 = vcvt.s32.f32 %v433_v1  ;;  %v434_v3 = vadd.s32 128, %v433_v1  ;;  %v3626_v9 = vld [vmem:[%s3615_s8] sm:$0xf]  ;;  %v632_v11 = vsel %vm630_vm0, %v452_v7, 0  ;;  %v449_v19 = vadd.s32 8, %v448_v10  ;;  %s3528_s18 = sshll.u32 %s4692_s26, 3 }
  0x10   : > { %v3631_v14 = vand.u32 4294901760, %v632_v11  ;;  %v462_v17 = vperm.slane %v3626_v9, 0  ;;  %v463_v22 = vperm.slane %v3626_v9, 2  ;;  %v635_v23 = vsel %vm630_vm0, %v453_v15, 0  ;;  %v455_v15 = vld [vmem:[%s3622_s11 + $0x18] sm:$0xff]  ;;  %s4086_s21 = scalar_lea.vmem %s4643_s0, %s3528_s18  ;;  %s4110_s25 = scalar_lea.vmem %s4644_s1, %s3528_s18 }
  0x11   : > { %v437_v4 = vadd.f32 0.5, %v435_v2  ;;  %v436_v5 = vcvt.s32.f32 %v434_v3  ;;  %v3649_v27 = vand.u32 4294901760, %v635_v23  ;;  %v3651_v28 = vcvt.s32.f32 %v449_v19  ;;  %v3744_v52 = vld [vmem:[%s3615_s8 + $0x4] sm:$0xf]  ;;  %s3534_s27 = sshll.u32 %s4692_s26, 4 }
  0x12   : > { %v3644_v24 = vsub.f32 %v632_v11, %v3631_v14  ;;  %v3655_v32 = vcvt.s32.f32 %v448_v10  ;;  %v638_v39 = vsel %vm630_vm0, %v454_v31, 0  ;;  %v641_v31 = vsel %vm630_vm0, %v455_v15, 0  ;;  %s4220_s30 = scalar_lea.vmem %s4649_s6, %s3534_s27  ;;  %s4585_s10 = scalar_lea.vmem %s4650_s7, %s3534_s27 }
  0x13   : > { %v439_v6 = vmul.f32 0.0625, %v437_v4  ;;  %v438_v8 = vadd.f32 0.5, %v436_v5  ;;  %v3661_v38 = vsub.f32 %v635_v23, %v3649_v27  ;;  %v3696_v63 = vand.u32 4294901760, %v638_v39 }
  0x14   : > { %v3658_v33 = vand.u32 4294901760, %v3644_v24 }
  0x15   : > { %v3629_v12 = vfloor.f32 %v439_v6  ;;  %v440_v13 = vmul.f32 0.0625, %v438_v8  ;;  %v3694_v62 = vand.u32 4294901760, %v3661_v38  ;;  %v3710_v23 = vsub.f32 %v638_v39, %v3696_v63 }
  0x16   : > { %v664_v49 = vsub.f32 %v3644_v24, %v3658_v33 }
  0x17   : > { %v443_v16 = vmul.f32 16.0, %v3629_v12  ;;  %v3636_v18 = vfloor.f32 %v440_v13  ;;  %v3716_v39 = vand.u32 4294901760, %v3710_v23 }
  0x18   : > { %v3701_v4 = vand.u32 4294901760, %v664_v49 }
  0x19   : > { %v3638_v20 = vsub.f32 %v435_v2, %v443_v16  ;;  %v444_v21 = vmul.f32 16.0, %v3636_v18 }
  0x1b   : > { %v470_v25 = vadd.f32 %v462_v17, %v3638_v20  ;;  %v3647_v26 = vsub.f32 %v436_v5, %v444_v21 }
  0x1d   : > { %v474_v29 = vfloor.f32 %v470_v25  ;;  %v471_v30 = vadd.f32 %v463_v22, %v3647_v26  ;;  %v672_v22 = vsub.f32 %v3661_v38, %v3694_v62 }
  0x1f   : > { %v478_v34 = vsub.f32 %v470_v25, %v474_v29  ;;  %v482_v35 = vperm.slane %v474_v29, 0  ;;  %v510_v36 = vadd.f32 1.0, %v474_v29  ;;  %v475_v37 = vfloor.f32 %v471_v30 }
  0x21   : > { %vm3665_vm1 = vcmp.eq.f32.partialorder %v3651_v28, %v482_v35  ;;  %v494_v41 = vsub.f32 1.0, %v478_v34  ;;  %v514_v42 = vperm.slane %v510_v36, 0  ;;  %v526_v43 = vperm.slane %v478_v34, 0 }
  0x22   : > { %vm3670_vm2 = vcmp.eq.f32.partialorder %v3655_v32, %v482_v35  ;;  %v479_v45 = vsub.f32 %v471_v30, %v475_v37  ;;  %v483_v46 = vperm.slane %v475_v37, 0  ;;  %v511_v47 = vadd.f32 1.0, %v475_v37 }
  0x23   : > { %v498_v48 = vperm.slane %v494_v41, 0  ;;  %vm520_vm3 = vcmp.eq.f32.partialorder %v3651_v28, %v514_v42  ;;  %vm518_vm4 = vcmp.eq.f32.partialorder %v3655_v32, %v514_v42  ;;  %v673_v41 = vand.u32 4294901760, %v672_v22 }
  0x24   : > { %v532_v50 = vsel %vm520_vm3, %v526_v43, 0.0  ;;  %v530_v51 = vsel %vm518_vm4, %v526_v43, 0.0  ;;  %vm3679_vm5 = vcmp.eq.f32.partialorder %v3651_v28, %v483_v46  ;;  %v495_v53 = vsub.f32 1.0, %v479_v45 }
  0x25   : > { %v504_v54 = vsel %vm3665_vm1, %v498_v48, 0.0  ;;  %v502_v55 = vsel %vm3670_vm2, %v498_v48, 0.0  ;;  %v515_v56 = vperm.slane %v511_v47, 0  ;;  %v527_v57 = vperm.slane %v479_v45, 0 }
  0x26   : > { %v540_v58 = vadd.f32 %v532_v50, %v504_v54  ;;  %v538_v59 = vadd.f32 %v530_v51, %v502_v55  ;;  %v499_v60 = vperm.slane %v495_v53, 0  ;;  %vm3688_vm6 = vcmp.eq.f32.partialorder %v3655_v32, %v483_v46 }
  0x27   : > { %vm521_vm7 = vcmp.eq.f32.partialorder %v3651_v28, %v515_v56  ;;  %vm519_vm8 = vcmp.eq.f32.partialorder %v3655_v32, %v515_v56  ;;  %v3718_v42 = vand.u32 4294901760, %v641_v31  ;;  %v680_v46 = vsub.f32 %v3710_v23, %v3716_v39 }
  0x28   : > { %v657_v0 = vand.u32 4294901760, %v540_v58  ;;  %v659_v1 = vand.u32 4294901760, %v538_v59  ;;  %v505_v2 = vsel %vm3679_vm5, %v499_v60, 0.0  ;;  %v533_v3 = vsel %vm521_vm7, %v527_v57, 0.0 }
  0x29   : > { %v541_v5 = vadd.f32 %v533_v3, %v505_v2  ;;  %v503_v6 = vsel %vm3688_vm6, %v499_v60, 0.0  ;;  %v531_v7 = vsel %vm519_vm8, %v527_v57, 0.0  ;;  %v3723_v47 = vsub.f32 %v641_v31, %v3718_v42 }
  0x2a   : > { %658 = vmatpush.msra.mxu0 %v657_v0  ;;  %v709_v8 = vsub.f32 %v540_v58, %v657_v0  ;;  %793 = vmatpush.msra.mxu3 %v657_v0  ;;  %v715_v10 = vsub.f32 %v538_v59, %v659_v1  ;;  %v539_v11 = vadd.f32 %v531_v7, %v503_v6  ;;  %v681_v48 = vand.u32 4294901760, %v680_v46 }
  0x2b   : > { %v909_v13 = vand.u32 4294901760, %v541_v5  ;;  %v3729_v49 = vand.u32 4294901760, %v3723_v47  ;;  %v464_v53 = vperm.slane %v3744_v52, 0  ;;  %v465_v22 = vperm.slane %v3744_v52, 2 }
  0x2c   : > { %660 = vmatpush.msra.mxu0 %v659_v1  ;;  %753 = vmatpush.msra.mxu2 %v709_v8  ;;  %v710_v16 = vand.u32 4294901760, %v709_v8  ;;  %v716_v17 = vand.u32 4294901760, %v715_v10  ;;  %v911_v19 = vand.u32 4294901760, %v539_v11 }
  0x2d   : > { %666 = vmatmul.f32.vlgmr.msra.gmra.mxu0 %v3701_v4  ;;  %795 = vmatpush.msra.mxu3 %v659_v1  ;;  %v961_v21 = vsub.f32 %v541_v5, %v909_v13  ;;  %v688_v50 = vsub.f32 %v3723_v47, %v3729_v49  ;;  %v472_v54 = vadd.f32 %v464_v53, %v3638_v20 }
  0x2e   : > { %756 = vmatpush.msra.mxu2 %v715_v10  ;;  %v711_v25 = vsub.f32 %v709_v8, %v710_v16  ;;  %799 = vmatmul.f32.vlgmr.msra.gmra.mxu3 %v3658_v33  ;;  %v717_v29 = vsub.f32 %v715_v10, %v716_v17  ;;  %v967_v30 = vsub.f32 %v539_v11, %v911_v19 }
  0x2f   : > { %759 = vmatmul.f32.vlgmr.msra.gmra.mxu2 %v3644_v24  ;;  %838 = vmatpush.msrb.mxu0 %v710_v16  ;;  %v962_v34 = vand.u32 4294901760, %v961_v21  ;;  %v689_v51 = vand.u32 4294901760, %v688_v50  ;;  %v476_v55 = vfloor.f32 %v472_v54 }
  0x30   : > { %v712_v35 = vand.u32 4294901760, %v711_v25  ;;  %910 = vmatpush.msrb.mxu2 %v909_v13  ;;  %v718_v36 = vand.u32 4294901760, %v717_v29  ;;  %v968_v37 = vand.u32 4294901760, %v967_v30  ;;  %v473_v25 = vadd.f32 %v465_v22, %v3647_v26  ;;  %v456_v29 = vld [vmem:[%s3622_s11 + $0x20] sm:$0xff] }
  0x31   : > { %v963_v40 = vsub.f32 %v961_v21, %v962_v34  ;;  %842 = vmatpush.msrb.mxu0 %v716_v17  ;;  %v480_v56 = vsub.f32 %v472_v54, %v476_v55  ;;  %v484_v57 = vperm.slane %v476_v55, 0  ;;  %v512_v58 = vadd.f32 1.0, %v476_v55  ;;  %v458_v55 = vld [vmem:[%s3622_s11 + $0x30] sm:$0xff] }
  0x32   : > { %713 = vmatpush.msra.mxu1 %v712_v35  ;;  %912 = vmatpush.msrb.mxu2 %v911_v19  ;;  %v969_v43 = vsub.f32 %v967_v30, %v968_v37 }
  0x33   : > { %v964_v44 = vand.u32 4294901760, %v963_v40  ;;  %1005 = vmatpush.msra.mxu0 %v961_v21  ;;  %v496_v59 = vsub.f32 1.0, %v480_v56  ;;  %v516_v60 = vperm.slane %v512_v58, 0  ;;  %v528_v61 = vperm.slane %v480_v56, 0 }
  0x34   : > { %1090 = vmatpush.msra.mxu2 %v962_v34  ;;  %719 = vmatpush.msra.mxu1 %v718_v36  ;;  %v970_v45 = vand.u32 4294901760, %v969_v43  ;;  %vm492_vm9 = vcmp.eq.f32.partialorder %v3651_v28, %v484_v57  ;;  %vm490_vm11 = vcmp.eq.f32.partialorder %v3655_v32, %v484_v57  ;;  %v457_v43 = vld [vmem:[%s3622_s11 + $0x28] sm:$0xff] }
  0x35   : > { %965 = vmatpush.msrb.mxu3 %v964_v44  ;;  %674 = vmatmul.f32.gmra.mxu0 %v673_v41  ;;  %vm524_vm10 = vcmp.eq.f32.partialorder %v3651_v28, %v516_v60  ;;  %vm522_vm12 = vcmp.eq.f32.partialorder %v3655_v32, %v516_v60  ;;  %v1151_v46 = vsel %vm630_vm0, %v457_v43, 0 }
  0x36   : > { %721 = vmatmul.f32.vlgmr.msra.gmra.mxu1 %v3631_v14  ;;  %805 = vmatmul.f32.gmra.mxu3 %v3694_v62  ;;  %v534_v6 = vsel %vm522_vm12, %v528_v61, 0.0  ;;  %v3791_v53 = vand.u32 4294901760, %v1151_v46 }
  0x37   : > { %875 = vmatpush.msrb.mxu1 %v657_v0  ;;  %764 = vmatmul.f32.gmra.mxu2 %v3661_v38  ;;  %v500_v0 = vperm.slane %v496_v59, 0 }
  0x38   : > { %971 = vmatpush.msrb.mxu3 %v970_v45  ;;  %1094 = vmatpush.msra.mxu2 %v968_v37  ;;  %v3798_v58 = vsub.f32 %v1151_v46, %v3791_v53 }
  0x39   : > { %877 = vmatpush.msrb.mxu1 %v659_v1  ;;  %1008 = vmatpush.msra.mxu0 %v967_v30  ;;  %v536_v1 = vsel %vm524_vm10, %v528_v61, 0.0  ;;  %v508_v2 = vsel %vm492_vm9, %v500_v0, 0.0  ;;  %v506_v5 = vsel %vm490_vm11, %v500_v0, 0.0  ;;  %v477_v30 = vfloor.f32 %v473_v25 }
  0x3a   : > { %1127 = vmatpush.msra.mxu3 %v909_v13  ;;  %v544_v3 = vadd.f32 %v536_v1, %v508_v2  ;;  %v542_v8 = vadd.f32 %v534_v6, %v506_v5  ;;  %v1154_v61 = vsel %vm630_vm0, %v458_v55, 0  ;;  %v3805_v1 = vand.u32 4294901760, %v3798_v58  ;;  %v459_v5 = vld [vmem:[%s3622_s11 + $0x38] sm:$0xff] }
  0x3b   : > { %1045 = vmatpush.msra.mxu1 %v909_v13  ;;  %v481_v31 = vsub.f32 %v473_v25, %v477_v30  ;;  %v485_v34 = vperm.slane %v477_v30, 0  ;;  %v3807_v2 = vand.u32 4294901760, %v1154_v61 }
  0x3c   : > { %1129 = vmatpush.msra.mxu3 %v911_v19  ;;  %v1175_v11 = vand.u32 4294901760, %v542_v8 }
  0x3d   : > { %1047 = vmatpush.msra.mxu1 %v911_v19  ;;  %682 = vmatmul.f32.gmra.mxu0 %v681_v48  ;;  %v497_v35 = vsub.f32 1.0, %v481_v31  ;;  %v529_v37 = vperm.slane %v481_v31, 0  ;;  %vm493_vm13 = vcmp.eq.f32.partialorder %v3651_v28, %v485_v34  ;;  %vm491_vm15 = vcmp.eq.f32.partialorder %v3655_v32, %v485_v34  ;;  %v3857_v34 = vld [vmem:[%s3851_s14] sm:$0xf] }
  0x3e   : > { %725 = vmatmul.f32.gmra.mxu1 %v3649_v27  ;;  %811 = vmatmul.f32.gmra.mxu3 %v3716_v39  ;;  %v1231_v15 = vsub.f32 %v542_v8, %v1175_v11  ;;  %v3813_v6 = vsub.f32 %v1154_v61, %v3807_v2 }
  0x3f   : > { %769 = vmatmul.f32.gmra.mxu2 %v3710_v23 }
  0x40   : > { %v1232_v17 = vand.u32 4294901760, %v1231_v15  ;;  %v3820_v8 = vand.u32 4294901760, %v3813_v6 }
  0x42   : > { %v1233_v19 = vsub.f32 %v1231_v15, %v1232_v17 }
  0x44   : > { %v1234_v21 = vand.u32 4294901760, %v1233_v19 }
  0x45   : > { %690 = vmatmul.f32.gmra.mxu0 %v689_v51 }
  0x46   : > { %729 = vmatmul.f32.gmra.mxu1 %v3696_v63  ;;  %817 = vmatmul.f32.gmra.mxu3 %v3729_v49 }
  0x47   : > { %774 = vmatmul.f32.gmra.mxu2 %v3723_v47 }
  0x4d   : > { %844 = vmatmul.f32.vlgmr.msrb.gmra.mxu0 %v3631_v14 }
  0x4e   : > { %733 = vmatmul.f32.gmra.mxu1 %v3718_v42  ;;  %973 = vmatmul.f32.vlgmr.msrb.gmra.mxu3 %v3631_v14 }
  0x4f   : > { %918 = vmatmul.f32.vlgmr.msrb.gmra.mxu2 %v3701_v4  ;;  %v1173_v4 = vand.u32 4294901760, %v544_v3 }
  0x51   : > { %v1225_v7 = vsub.f32 %v544_v3, %v1173_v4  ;;  %1174 = vmatpush.msrb.mxu0 %v1173_v4  ;;  %1309 = vmatpush.msrb.mxu3 %v1173_v4 }
  0x53   : > { %1269 = vmatpush.msrb.mxu2 %v1225_v7  ;;  %v1226_v10 = vand.u32 4294901760, %v1225_v7  ;;  %1311 = vmatpush.msrb.mxu3 %v1175_v11 }
  0x54   : > { %1176 = vmatpush.msrb.mxu0 %v1175_v11 }
  0x55   : > { %848 = vmatmul.f32.gmra.mxu0 %v3649_v27  ;;  %v1227_v13 = vsub.f32 %v1225_v7, %v1226_v10  ;;  %1272 = vmatpush.msrb.mxu2 %v1231_v15 }
  0x56   : > { %879 = vmatmul.f32.vlgmr.msrb.gmra.mxu1 %v3631_v14  ;;  %977 = vmatmul.f32.gmra.mxu3 %v3649_v27 }
  0x57   : > { %926 = vmatmul.f32.gmra.mxu2 %v673_v41  ;;  %v1228_v16 = vand.u32 4294901760, %v1227_v13 }
  0x59   : > { %1229 = vmatpush.msrb.mxu1 %v1228_v16 }
  0x5b   : > { %1235 = vmatpush.msrb.mxu1 %v1234_v21 }
  0x5d   : > { %852 = vmatmul.f32.gmra.mxu0 %v3696_v63 }
  0x5e   : > { %883 = vmatmul.f32.gmra.mxu1 %v3649_v27  ;;  %981 = vmatmul.f32.gmra.mxu3 %v3696_v63 }
  0x5f   : > { %934 = vmatmul.f32.gmra.mxu2 %v681_v48 }
  0x65   : > { %856 = vmatmul.f32.gmra.mxu0 %v3718_v42 }
  0x66   : > { %887 = vmatmul.f32.gmra.mxu1 %v3696_v63  ;;  %985 = vmatmul.f32.gmra.mxu3 %v3718_v42 }
  0x67   : > { %942 = vmatmul.f32.gmra.mxu2 %v689_v51 }
  0x6d   : > { %1011 = vmatmul.f32.vlgmr.msra.gmra.mxu0 %v3644_v24  ;;  %v513_v24 = vadd.f32 1.0, %v477_v30 }
  0x6e   : > { %891 = vmatmul.f32.gmra.mxu1 %v3718_v42  ;;  %1131 = vmatmul.f32.vlgmr.msra.gmra.mxu3 %v3631_v14 }
  0x6f   : > { %1096 = vmatmul.f32.vlgmr.msra.gmra.mxu2 %v3631_v14  ;;  %1354 = vmatpush.msra.mxu0 %v1226_v10  ;;  %v1148_v14 = vsel %vm630_vm0, %v456_v29, 0  ;;  %v517_v36 = vperm.slane %v513_v24, 0  ;;  %v1745_v24 = vperm.slane %v3857_v34, 0 }
  0x70   : > { %v3774_v40 = vand.u32 4294901760, %v1148_v14 }
  0x71   : > { %1358 = vmatpush.msra.mxu0 %v1232_v17  ;;  %vm525_vm14 = vcmp.eq.f32.partialorder %v3651_v28, %v517_v36  ;;  %vm523_vm1 = vcmp.eq.f32.partialorder %v3655_v32, %v517_v36  ;;  %v1753_v36 = vadd.f32 %v1745_v24, %v3638_v20 }
  0x72   : > { %v537_v41 = vsel %vm525_vm14, %v529_v37, 0.0  ;;  %v535_v50 = vsel %vm523_vm1, %v529_v37, 0.0 }
  0x75   : > { %1016 = vmatmul.f32.gmra.mxu0 %v3661_v38  ;;  %v501_v38 = vperm.slane %v497_v35, 0 }
  0x76   : > { %1051 = vmatmul.f32.vlgmr.msra.gmra.mxu1 %v3658_v33  ;;  %1135 = vmatmul.f32.gmra.mxu3 %v3649_v27 }
  0x77   : > { %1100 = vmatmul.f32.gmra.mxu2 %v3649_v27  ;;  %1391 = vmatpush.msra.mxu1 %v1173_v4  ;;  %v509_v33 = vsel %vm493_vm13, %v501_v38, 0.0  ;;  %v3780_v27 = vsub.f32 %v1148_v14, %v3774_v40 }
  0x78   : > { %v545_v44 = vadd.f32 %v537_v41, %v509_v33  ;;  %v1757_v33 = vfloor.f32 %v1753_v36 }
  0x79   : > { %1393 = vmatpush.msra.mxu1 %v1175_v11  ;;  %v3789_v51 = vand.u32 4294901760, %v3780_v27 }
  0x7a   : > { %v1425_v45 = vand.u32 4294901760, %v545_v44  ;;  %v1793_v46 = vadd.f32 1.0, %v1757_v33 }
  0x7c   : > { %1426 = vmatpush.msra.mxu2 %v1425_v45  ;;  %v1477_v48 = vsub.f32 %v545_v44, %v1425_v45  ;;  %v1761_v44 = vsub.f32 %v1753_v36, %v1757_v33 }
  0x7d   : > { %1021 = vmatmul.f32.gmra.mxu0 %v3710_v23  ;;  %v507_v23 = vsel %vm491_vm15, %v501_v38, 0.0 }
  0x7e   : > { %1057 = vmatmul.f32.gmra.mxu1 %v3694_v62  ;;  %1139 = vmatmul.f32.gmra.mxu3 %v3696_v63  ;;  %v543_v62 = vadd.f32 %v535_v50, %v507_v23  ;;  %v1478_v54 = vand.u32 4294901760, %v1477_v48  ;;  %v546_v23 = vperm.slane %v3626_v9, 1  ;;  %v1777_v50 = vsub.f32 1.0, %v1761_v44 }
  0x7f   : > { %1104 = vmatmul.f32.gmra.mxu2 %v3696_v63  ;;  %v1180_v63 = vsub.f32 %v3780_v27, %v3789_v51 }
  0x80   : > { %v1427_v56 = vand.u32 4294901760, %v543_v62  ;;  %v1479_v57 = vsub.f32 %v1477_v48, %v1478_v54 }
  0x82   : > { %1428 = vmatpush.msra.mxu2 %v1427_v56  ;;  %v1483_v59 = vsub.f32 %v543_v62, %v1427_v56  ;;  %v1480_v60 = vand.u32 4294901760, %v1479_v57  ;;  %v1797_v62 = vperm.slane %v1793_v46, 0  ;;  %v1781_v57 = vperm.slane %v1777_v50, 0 }
  0x84   : > { %v1484_v0 = vand.u32 4294901760, %v1483_v59  ;;  %1481 = vmatpush.msra.mxu3 %v1480_v60  ;;  %vm1803_vm3 = vcmp.eq.f32.partialorder %v3651_v28, %v1797_v62  ;;  %v554_v60 = vadd.f32 %v546_v23, %v3629_v12  ;;  %vm1801_vm5 = vcmp.eq.f32.partialorder %v3655_v32, %v1797_v62 }
  0x85   : > { %1026 = vmatmul.f32.gmra.mxu0 %v3723_v47  ;;  %v1181_v47 = vand.u32 4294901760, %v1180_v63 }
  0x86   : > { %1063 = vmatmul.f32.gmra.mxu1 %v3716_v39  ;;  %1143 = vmatmul.f32.gmra.mxu3 %v3718_v42  ;;  %v1485_v3 = vsub.f32 %v1483_v59, %v1484_v0  ;;  %v1188_v39 = vsub.f32 %v3798_v58, %v3805_v1 }
  0x87   : > { %1108 = vmatmul.f32.gmra.mxu2 %v3718_v42  ;;  %v1157_v42 = vsel %vm630_vm0, %v459_v5, 0 }
  0x88   : > { %v1486_v4 = vand.u32 4294901760, %v1485_v3  ;;  %v1189_v7 = vand.u32 4294901760, %v1188_v39  ;;  %v3822_v10 = vand.u32 4294901760, %v1157_v42  ;;  %v558_v39 = vfloor.f32 %v554_v60 }
  0x8a   : > { %1487 = vmatpush.msra.mxu3 %v1486_v4  ;;  %v3827_v11 = vsub.f32 %v1157_v42, %v3822_v10 }
  0x8c   : > { %v3833_v15 = vand.u32 4294901760, %v3827_v11 }
  0x8d   : > { %1182 = vmatmul.f32.vlgmr.msrb.gmra.mxu0 %v1181_v47 }
  0x8e   : > { %1069 = vmatmul.f32.gmra.mxu1 %v3729_v49  ;;  %1315 = vmatmul.f32.vlgmr.msrb.gmra.mxu3 %v3789_v51  ;;  %v1196_v49 = vsub.f32 %v3813_v6, %v3820_v8  ;;  %v1204_v16 = vsub.f32 %v3827_v11, %v3833_v15 }
  0x8f   : > { %1275 = vmatmul.f32.vlgmr.msrb.gmra.mxu2 %v3780_v27  ;;  %1521 = vmatpush.msrb.mxu0 %v1477_v48 }
  0x90   : > { %1606 = vmatpush.msrb.mxu2 %v1478_v54  ;;  %1643 = vmatpush.msrb.mxu3 %v1425_v45  ;;  %v1197_v13 = vand.u32 4294901760, %v1196_v49  ;;  %v1205_v17 = vand.u32 4294901760, %v1204_v16  ;;  %v1809_v54 = vperm.slane %v1761_v44, 0 }
  0x91   : > { %1524 = vmatpush.msrb.mxu0 %v1483_v59 }
  0x92   : > { %1610 = vmatpush.msrb.mxu2 %v1484_v0  ;;  %1645 = vmatpush.msrb.mxu3 %v1427_v56  ;;  %v1815_v61 = vsel %vm1803_vm3, %v1809_v54, 0.0  ;;  %v1813_v16 = vsel %vm1801_vm5, %v1809_v54, 0.0  ;;  %vm3023_vm3 = vcmask 1041408  }
  0x95   : > { %1190 = vmatmul.f32.gmra.mxu0 %v1189_v7 }
  0x96   : > { %1237 = vmatmul.f32.vlgmr.msrb.gmra.mxu1 %v3774_v40  ;;  %1321 = vmatmul.f32.gmra.mxu3 %v3805_v1 }
  0x97   : > { %1280 = vmatmul.f32.gmra.mxu2 %v3798_v58  ;;  %1561 = vmatpush.msrb.mxu1 %v1425_v45  ;;  %v1765_v45 = vperm.slane %v1757_v33, 0 }
  0x99   : > { %1563 = vmatpush.msrb.mxu1 %v1427_v56  ;;  %vm1771_vm2 = vcmp.eq.f32.partialorder %v3651_v28, %v1765_v45  ;;  %vm1769_vm4 = vcmp.eq.f32.partialorder %v3655_v32, %v1765_v45  ;;  %v1735_v45 = vld [vmem:[%s3898_s17] sm:$0xff] }
  0x9d   : > { %1198 = vmatmul.f32.gmra.mxu0 %v1197_v13 }
  0x9e   : > { %1241 = vmatmul.f32.gmra.mxu1 %v3791_v53  ;;  %1327 = vmatmul.f32.gmra.mxu3 %v3820_v8 }
  0x9f   : > { %1285 = vmatmul.f32.gmra.mxu2 %v3813_v6 }
  0xa5   : > { %1206 = vmatmul.f32.gmra.mxu0 %v1205_v17 }
  0xa6   : > { %1245 = vmatmul.f32.gmra.mxu1 %v3807_v2  ;;  %1333 = vmatmul.f32.gmra.mxu3 %v3833_v15 }
  0xa7   : > { %1290 = vmatmul.f32.gmra.mxu2 %v3827_v11 }
  0xaa   : > { %v667_v19 = vpop.f32.mrf.mxu0 }
  0xad   : > { %1360 = vmatmul.f32.vlgmr.msra.gmra.mxu0 %v3774_v40 }
  0xae   : > { %1249 = vmatmul.f32.gmra.mxu1 %v3822_v10  ;;  %1489 = vmatmul.f32.vlgmr.msra.gmra.mxu3 %v3774_v40 }
  0xaf   : > { %1434 = vmatmul.f32.vlgmr.msra.gmra.mxu2 %v1181_v47  ;;  %v1787_v47 = vsel %vm1771_vm2, %v1781_v57, 0.0 }
  0xb0   : > { %v1823_v4 = vadd.f32 %v1815_v61, %v1787_v47  ;;  %v1746_v61 = vperm.slane %v3857_v34, 2 }
  0xb1   : > { %v800_v21 = vpop.f32.mrf.mxu3 }
  0xb2   : > { %v675_v22 = vpop.f32.mrf.mxu0  ;;  %v760_v25 = vpop.f32.mrf.mxu2  ;;  %v3877_v42 = vand.u32 4294901760, %v1823_v4 }
  0xb3   : > { %v722_v29 = vpop.f32.mrf.mxu1 }
  0xb4   : > { %v723_v30 = vadd.f32 %v722_v29, %v667_v19  ;;  %v1991_v49 = vsub.f32 %v1823_v4, %v3877_v42  ;;  %1940 = vmatpush.msra.mxu0 %v3877_v42  ;;  %2075 = vmatpush.msra.mxu3 %v3877_v42  ;;  %v1754_v4 = vadd.f32 %v1746_v61, %v3647_v26 }
  0xb5   : > { %1364 = vmatmul.f32.gmra.mxu0 %v3791_v53 }
  0xb6   : > { %v761_v31 = vadd.f32 %v760_v25, %v723_v30  ;;  %1395 = vmatmul.f32.vlgmr.msra.gmra.mxu1 %v3774_v40  ;;  %1493 = vmatmul.f32.gmra.mxu3 %v3791_v53  ;;  %v562_v25 = vsub.f32 %v554_v60, %v558_v39  ;;  %v1992_v29 = vand.u32 4294901760, %v1991_v49 }
  0xb7   : > { %1442 = vmatmul.f32.gmra.mxu2 %v1189_v7 }
  0xb8   : > { %v3860_v14 = vadd.f32 %v800_v21, %v761_v31  ;;  %2035 = vmatpush.msra.mxu2 %v1991_v49  ;;  %v594_v31 = vadd.f32 1.0, %v558_v39  ;;  %v610_v23 = vperm.slane %v562_v25, 0 }
  0xb9   : > { %v806_v35 = vpop.f32.mrf.mxu3 }
  0xba   : > { %v683_v37 = vpop.f32.mrf.mxu0  ;;  %v765_v38 = vpop.f32.mrf.mxu2  ;;  %v598_v33 = vperm.slane %v594_v31, 0 }
  0xbb   : > { %v726_v41 = vpop.f32.mrf.mxu1 }
  0xbc   : > { %v727_v43 = vadd.f32 %v726_v41, %v675_v22  ;;  %v566_v41 = vperm.slane %v558_v39, 0  ;;  %vm602_vm7 = vcmp.eq.f32.partialorder %v3655_v32, %v598_v33  ;;  %vm604_vm9 = vcmp.eq.f32.partialorder %v3651_v28, %v598_v33 }
  0xbd   : > { %1368 = vmatmul.f32.gmra.mxu0 %v3807_v2  ;;  %v614_v60 = vsel %vm602_vm7, %v610_v23, 0.0 }
  0xbe   : > { %v766_v48 = vadd.f32 %v765_v38, %v727_v43  ;;  %1399 = vmatmul.f32.gmra.mxu1 %v3791_v53  ;;  %1497 = vmatmul.f32.gmra.mxu3 %v3807_v2  ;;  %vm3909_vm6 = vcmp.eq.f32.partialorder %v3655_v32, %v566_v41  ;;  %vm3915_vm8 = vcmp.eq.f32.partialorder %v3651_v28, %v566_v41 }
  0xbf   : > { %1450 = vmatmul.f32.gmra.mxu2 %v1197_v13  ;;  %v1785_v13 = vsel %vm1769_vm4, %v1781_v57, 0.0  ;;  %v1914_v57 = vsel %vm630_vm0, %v1735_v45, 0 }
  0xc0   : > { %v3867_v55 = vadd.f32 %v806_v35, %v766_v48  ;;  %v1821_v21 = vadd.f32 %v1813_v16, %v1785_v13  ;;  %v1993_v35 = vsub.f32 %v1991_v49, %v1992_v29  ;;  %v1758_v13 = vfloor.f32 %v1754_v4  ;;  %v1736_v16 = vld [vmem:[%s3898_s17 + $0x8] sm:$0xff] }
  0xc1   : > { %v812_v56 = vpop.f32.mrf.mxu3 }
  0xc2   : > { %v3871_v63 = vpop.f32.mrf.mxu0  ;;  %v770_v59 = vpop.f32.mrf.mxu2  ;;  %v1941_v24 = vand.u32 4294901760, %v1821_v21  ;;  %v1994_v38 = vand.u32 4294901760, %v1993_v35  ;;  %v1794_v31 = vadd.f32 1.0, %v1758_v13  ;;  %v1766_v35 = vperm.slane %v1758_v13, 0 }
  0xc3   : > { %v730_v0 = vpop.f32.mrf.mxu1 }
  0xc4   : > { %v731_v3 = vadd.f32 %v730_v0, %v683_v37  ;;  %v1997_v36 = vsub.f32 %v1821_v21, %v1941_v24  ;;  %2077 = vmatpush.msra.mxu3 %v1941_v24  ;;  %v578_v37 = vsub.f32 1.0, %v562_v25  ;;  %1942 = vmatpush.msra.mxu0 %v1941_v24  ;;  %v1762_v25 = vsub.f32 %v1754_v4, %v1758_v13 }
  0xc5   : > { %1372 = vmatmul.f32.gmra.mxu0 %v3822_v10  ;;  %1995 = vmatpush.msra.mxu1 %v1994_v38  ;;  %v1798_v41 = vperm.slane %v1794_v31, 0  ;;  %vm1772_vm10 = vcmp.eq.f32.partialorder %v3651_v28, %v1766_v35  ;;  %vm1770_vm12 = vcmp.eq.f32.partialorder %v3655_v32, %v1766_v35 }
  0xc6   : > { %v771_v5 = vadd.f32 %v770_v59, %v731_v3  ;;  %1403 = vmatmul.f32.gmra.mxu1 %v3807_v2  ;;  %1501 = vmatmul.f32.gmra.mxu3 %v3822_v10  ;;  %v582_v48 = vperm.slane %v578_v37, 0  ;;  %v3931_v3 = vand.u32 4294901760, %v1914_v57  ;;  %v1810_v37 = vperm.slane %v1762_v25, 0 }
  0xc7   : > { %1458 = vmatmul.f32.gmra.mxu2 %v1205_v17  ;;  %vm1804_vm11 = vcmp.eq.f32.partialorder %v3651_v28, %v1798_v41  ;;  %vm1802_vm13 = vcmp.eq.f32.partialorder %v3655_v32, %v1798_v41 }
  0xc8   : > { %v3881_v7 = vadd.f32 %v812_v56, %v771_v5  ;;  %2038 = vmatpush.msra.mxu2 %v1997_v36  ;;  %v586_v59 = vsel %vm3909_vm6, %v582_v48, 0.0  ;;  %v588_v47 = vsel %vm3915_vm8, %v582_v48, 0.0  ;;  %vm3251_vm6 = vcmask 1042432  }
  0xc9   : > { %v3886_v19 = vpop.f32.mrf.mxu3 }
  0xca   : > { %v845_v22 = vpop.f32.mrf.mxu0  ;;  %v3888_v17 = vpop.f32.mrf.mxu2 }
  0xcb   : > { %v3890_v30 = vpop.f32.mrf.mxu1  ;;  %v846_v0 = vadd.f32 %v845_v22, %v3860_v14 }
  0xcd   : > { %1527 = vmatmul.f32.vlgmr.msrb.gmra.mxu0 %v3780_v27  ;;  %v1998_v27 = vand.u32 4294901760, %v1997_v36 }
  0xce   : > { %1407 = vmatmul.f32.gmra.mxu1 %v3822_v10  ;;  %1647 = vmatmul.f32.vlgmr.msrb.gmra.mxu3 %v3774_v40 }
  0xcf   : > { %1612 = vmatmul.f32.vlgmr.msrb.gmra.mxu2 %v3774_v40  ;;  %v1999_v44 = vsub.f32 %v1997_v36, %v1998_v27  ;;  %2120 = vmatpush.msrb.mxu0 %v1992_v29  ;;  %v1778_v36 = vsub.f32 1.0, %v1762_v25 }
  0xd1   : > { %v3903_v43 = vpop.f32.mrf.mxu3  ;;  %v2000_v54 = vand.u32 4294901760, %v1999_v44  ;;  %2124 = vmatpush.msrb.mxu0 %v1998_v27  ;;  %v547_v44 = vperm.slane %v3626_v9, 3 }
  0xd2   : > { %v849_v46 = vpop.f32.mrf.mxu0  ;;  %v3906_v50 = vpop.f32.mrf.mxu2 }
  0xd3   : > { %v880_v40 = vpop.f32.mrf.mxu1  ;;  %2001 = vmatpush.msra.mxu1 %v2000_v54  ;;  %v850_v34 = vadd.f32 %v849_v46, %v3867_v55  ;;  %v1917_v55 = vsel %vm630_vm0, %v1736_v16, 0 }
  0xd4   : > { %v881_v5 = vadd.f32 %v880_v40, %v846_v0 }
  0xd5   : > { %1532 = vmatmul.f32.gmra.mxu0 %v3798_v58  ;;  %v616_v58 = vsel %vm604_vm9, %v610_v23, 0.0  ;;  %v1816_v23 = vsel %vm1804_vm11, %v1810_v37, 0.0  ;;  %vm3256_vm9 = vcmask 1043456   ;;  %vm3261_vm11 = vcmask 1044480  }
  0xd6   : > { %1567 = vmatmul.f32.vlgmr.msrb.gmra.mxu1 %v3789_v51  ;;  %1651 = vmatmul.f32.gmra.mxu3 %v3791_v53  ;;  %v3935_v51 = vadd.f32 %v614_v60, %v586_v59  ;;  %v1814_v60 = vsel %vm1802_vm13, %v1810_v37, 0.0 }
  0xd7   : > { %1616 = vmatmul.f32.gmra.mxu2 %v3791_v53  ;;  %2157 = vmatpush.msrb.mxu1 %v3877_v42  ;;  %v3940_v53 = vadd.f32 %v616_v58, %v588_v47  ;;  %v3946_v42 = vsub.f32 %v1914_v57, %v3931_v3  ;;  %v555_v57 = vadd.f32 %v547_v44, %v3636_v18 }
  0xd8   : > { %v1663_v29 = vmul.f32 %v881_v5, %v3935_v51 }
  0xd9   : > { %v3937_v39 = vpop.f32.mrf.mxu3  ;;  %2159 = vmatpush.msrb.mxu1 %v1941_v24  ;;  %v3956_v38 = vand.u32 4294901760, %v3946_v42 }
  0xda   : > { %v853_v14 = vpop.f32.mrf.mxu0  ;;  %v3942_v49 = vpop.f32.mrf.mxu2 }
  0xdb   : > { %v884_v21 = vpop.f32.mrf.mxu1  ;;  %v1946_v54 = vsub.f32 %v3946_v42, %v3956_v38  ;;  %v854_v47 = vadd.f32 %v853_v14, %v3881_v7 }
  0xdc   : > { %v885_v22 = vadd.f32 %v884_v21, %v850_v34  ;;  %v3998_v34 = vfloor.f32 %v555_v57 }
  0xdd   : > { %1537 = vmatmul.f32.gmra.mxu0 %v3813_v6  ;;  %v735_v6 = vadd.f32 %v3890_v30, %v3871_v63  ;;  %v1737_v30 = vld [vmem:[%s3898_s17 + $0x10] sm:$0xff]  ;;  %v3991_v58 = vand.u32 4294901760, %v1946_v54 }
  0xde   : > { %v1665_v24 = vmul.f32 %v885_v22, %v3940_v53  ;;  %1573 = vmatmul.f32.gmra.mxu1 %v3805_v1  ;;  %1655 = vmatmul.f32.gmra.mxu3 %v3807_v2  ;;  %v1782_v1 = vperm.slane %v1778_v36, 0  ;;  %v563_v35 = vsub.f32 %v555_v57, %v3998_v34  ;;  %v567_v57 = vperm.slane %v3998_v34, 0 }
  0xdf   : > { %1620 = vmatmul.f32.gmra.mxu2 %v3807_v2  ;;  %v3967_v2 = vand.u32 4294901760, %v1917_v55  ;;  %v776_v40 = vadd.f32 %v3888_v17, %v735_v6  ;;  %v1920_v17 = vsel %vm630_vm0, %v1737_v30, 0 }
  0xe0   : > { %v3960_v33 = vadd.f32 %v1665_v24, %v1663_v29  ;;  %v1788_v48 = vsel %vm1772_vm10, %v1782_v1, 0.0  ;;  %v1786_v56 = vsel %vm1770_vm12, %v1782_v1, 0.0  ;;  %v4003_v13 = vand.u32 4294901760, %v1920_v17  ;;  %v1738_v29 = vld [vmem:[%s3898_s17 + $0x18] sm:$0xff] }
  0xe1   : > { %v3963_v27 = vpop.f32.mrf.mxu3  ;;  %v1824_v63 = vadd.f32 %v1816_v23, %v1788_v48  ;;  %v3982_v59 = vsub.f32 %v1917_v55, %v3967_v2  ;;  %v1822_v61 = vadd.f32 %v1814_v60, %v1786_v56  ;;  %v1923_v44 = vsel %vm630_vm0, %v1738_v29, 0 }
  0xe2   : > { %v857_v45 = vpop.f32.mrf.mxu0  ;;  %v3969_v46 = vpop.f32.mrf.mxu2  ;;  %v4015_v37 = vsub.f32 %v1920_v17, %v4003_v13  ;;  %v579_v54 = vsub.f32 1.0, %v563_v35  ;;  %vm4047_vm14 = vcmp.eq.f32.partialorder %v3655_v32, %v567_v57  ;;  %vm4057_vm1 = vcmp.eq.f32.partialorder %v3651_v28, %v567_v57 }
  0xe3   : > { %v888_v62 = vpop.f32.mrf.mxu1  ;;  %v3978_v9 = vand.u32 4294901760, %v1824_v63  ;;  %v3994_v4 = vand.u32 4294901760, %v1822_v61 }
  0xe4   : > { %v889_v16 = vadd.f32 %v888_v62, %v854_v47 }
  0xe5   : > { %1542 = vmatmul.f32.gmra.mxu0 %v3827_v11  ;;  %v2243_v0 = vsub.f32 %v1824_v63, %v3978_v9  ;;  %v819_v11 = vadd.f32 %v3886_v19, %v776_v40  ;;  %2192 = vmatpush.msrb.mxu2 %v3978_v9  ;;  %v2249_v21 = vsub.f32 %v1822_v61, %v3994_v4 }
  0xe6   : > { %1579 = vmatmul.f32.gmra.mxu1 %v3820_v8  ;;  %1659 = vmatmul.f32.gmra.mxu3 %v3822_v10  ;;  %v1699_v41 = vmul.f32 %v889_v16, %v3935_v51  ;;  %v975_v63 = vadd.f32 %v3903_v43, %v3906_v50 }
  0xe7   : > { %1624 = vmatmul.f32.gmra.mxu2 %v3822_v10  ;;  %v2244_v5 = vand.u32 4294901760, %v2243_v0  ;;  %v4001_v10 = vand.u32 4294901760, %v3982_v59  ;;  %v858_v19 = vadd.f32 %v857_v45, %v819_v11  ;;  %v2250_v55 = vand.u32 4294901760, %v2249_v21 }
  0xe8   : > { %2194 = vmatpush.msrb.mxu2 %v3994_v4  ;;  %v595_v45 = vadd.f32 1.0, %v3998_v34  ;;  %v611_v11 = vperm.slane %v563_v35, 0 }
  0xe9   : > { %v3996_v8 = vpop.f32.mrf.mxu3  ;;  %v2245_v25 = vsub.f32 %v2243_v0, %v2244_v5  ;;  %v1954_v36 = vsub.f32 %v3982_v59, %v4001_v10  ;;  %v2251_v1 = vsub.f32 %v2249_v21, %v2250_v55 }
  0xea   : > { %v1012_v7 = vpop.f32.mrf.mxu0  ;;  %v4005_v14 = vpop.f32.mrf.mxu2  ;;  %v599_v60 = vperm.slane %v595_v45, 0 }
  0xeb   : > { %v892_v22 = vpop.f32.mrf.mxu1  ;;  %v2246_v24 = vand.u32 4294901760, %v2245_v25  ;;  %v2252_v23 = vand.u32 4294901760, %v2251_v1  ;;  %v4026_v62 = vand.u32 4294901760, %v1954_v36  ;;  %v1013_v17 = vadd.f32 %v1012_v7, %v975_v63 }
  0xec   : > { %v893_v31 = vadd.f32 %v892_v22, %v858_v19  ;;  %vm603_vm15 = vcmp.eq.f32.partialorder %v3655_v32, %v599_v60  ;;  %vm605_vm2 = vcmp.eq.f32.partialorder %v3651_v28, %v599_v60  ;;  %v3202_v60 = vld [vmem:[%s4086_s21] sm:$0x77] }
  0xed   : > { %1948 = vmatmul.f32.vlgmr.msra.gmra.mxu0 %v3991_v58  ;;  %2247 = vmatpush.msrb.mxu3 %v2246_v24 }
  0xee   : > { %v1701_v6 = vmul.f32 %v893_v31, %v3940_v53  ;;  %1585 = vmatmul.f32.gmra.mxu1 %v3833_v15  ;;  %2081 = vmatmul.f32.vlgmr.msra.gmra.mxu3 %v3956_v38  ;;  %v4029_v15 = vand.u32 4294901760, %v4015_v37  ;;  %v4031_v53 = vand.u32 4294901760, %v1923_v44 }
  0xef   : > { %2041 = vmatmul.f32.vlgmr.msra.gmra.mxu2 %v3946_v42  ;;  %2287 = vmatpush.msra.mxu0 %v2243_v0  ;;  %v583_v0 = vperm.slane %v579_v54, 0 }
  0xf0   : > { %v4024_v48 = vadd.f32 %v1701_v6, %v1699_v41  ;;  %2372 = vmatpush.msra.mxu2 %v2244_v5  ;;  %2253 = vmatpush.msrb.mxu3 %v2252_v23  ;;  %v1962_v61 = vsub.f32 %v4015_v37, %v4029_v15  ;;  %v4041_v43 = vsub.f32 %v1923_v44, %v4031_v53 }
  0xf1   : > { %v1132_v51 = vpop.f32.mrf.mxu3  ;;  %2290 = vmatpush.msra.mxu0 %v2249_v21  ;;  %v979_v5 = vadd.f32 %v3937_v39, %v3942_v49  ;;  %v587_v39 = vsel %vm4047_vm14, %v583_v0, 0.0  ;;  %v615_v49 = vsel %vm603_vm15, %v611_v11, 0.0  ;;  %v589_v31 = vsel %vm4057_vm1, %v583_v0, 0.0 }
  0xf2   : > { %v1017_v30 = vpop.f32.mrf.mxu0  ;;  %v1097_v40 = vpop.f32.mrf.mxu2  ;;  %2376 = vmatpush.msra.mxu2 %v2250_v55  ;;  %2409 = vmatpush.msra.mxu3 %v3978_v9  ;;  %v4062_v16 = vand.u32 4294901760, %v1962_v61  ;;  %v4065_v7 = vand.u32 4294901760, %v4041_v43  ;;  %v617_v55 = vsel %vm605_vm2, %v611_v11, 0.0  ;;  %v623_v35 = vadd.f32 %v615_v49, %v587_v39 }
  0xf3   : > { %v1052_v56 = vpop.f32.mrf.mxu1  ;;  %v1018_v21 = vadd.f32 %v1017_v30, %v979_v5  ;;  %v625_v6 = vadd.f32 %v617_v55, %v589_v31  ;;  %v983_v23 = vadd.f32 %v3963_v27, %v3969_v46  ;;  %v3204_v61 = vmul.f32 0.5, %v3202_v60  ;;  %v4120_v60 = vld [vmem:[%s3851_s14 + $0x4] sm:$0xf] }
  0xf4   : > { %2411 = vmatpush.msra.mxu3 %v3994_v4  ;;  %v1053_v50 = vadd.f32 %v1052_v56, %v1013_v17  ;;  %v1672_v17 = vrot.slane %v3960_v33, 4  ;;  %v1708_v46 = vrot.slane %v4024_v48, 4  ;;  %v987_v11 = vadd.f32 %v3996_v8, %v4005_v14 }
  0xf5   : > { %1956 = vmatmul.f32.gmra.mxu0 %v4026_v62  ;;  %v3206_v27 = vadd.f32 0.5, %v3204_v61 }
  0xf6   : > { %2003 = vmatmul.f32.vlgmr.msra.gmra.mxu1 %v3931_v3  ;;  %2087 = vmatmul.f32.gmra.mxu3 %v4001_v10  ;;  %v1673_v5 = vadd.f32 %v1672_v17, %v3960_v33 }
  0xf7   : > { %2046 = vmatmul.f32.gmra.mxu2 %v3982_v59  ;;  %2327 = vmatpush.msra.mxu1 %v3978_v9  ;;  %v1098_v9 = vadd.f32 %v1097_v40, %v1053_v50  ;;  %3212 = vst [vmem:[#allocation1] ss:$2 sm:$0xff] %v3206_v27 }
  0xf8   : > { %v1674_v31 = vrot.slane %v1673_v5, 2 }
  0xf9   : > { %v1136_v19 = vpop.f32.mrf.mxu3  ;;  %2329 = vmatpush.msra.mxu1 %v3994_v4  ;;  %v1970_v4 = vsub.f32 %v4041_v43, %v4065_v7  ;;  %v1133_v36 = vadd.f32 %v1132_v51, %v1098_v9 }
  0xfa   : > { %v1022_v22 = vpop.f32.mrf.mxu0  ;;  %v1101_v25 = vpop.f32.mrf.mxu2 }
  0xfb   : > { %v1058_v29 = vpop.f32.mrf.mxu1  ;;  %v4079_v45 = vand.u32 4294901760, %v1970_v4  ;;  %v1664_v51 = vmul.f32 %v1133_v36, %v623_v35  ;;  %v1023_v56 = vadd.f32 %v1022_v22, %v983_v23  ;;  %v1675_v4 = vadd.f32 %v1674_v31, %v1673_v5 }
  0xfc   : > { %v1059_v24 = vadd.f32 %v1058_v29, %v1018_v21 }
  0xfd   : > { %1964 = vmatmul.f32.gmra.mxu0 %v4062_v16 }
  0xfe   : > { %v1102_v41 = vadd.f32 %v1101_v25, %v1059_v24  ;;  %2007 = vmatmul.f32.gmra.mxu1 %v3967_v2  ;;  %2093 = vmatmul.f32.gmra.mxu3 %v4029_v15  ;;  %v1709_v25 = vadd.f32 %v1708_v46, %v4024_v48  ;;  %v4128_v46 = vld.sshfl [vmem:[#allocation1] sm:$0xff pattern:$0x75316420]  ;;  %v4130_v5 = vld.sshfl [vmem:[#allocation1 + $0x8] sm:$0xff pattern:$0x75316420] }
  0xff   : > { %2051 = vmatmul.f32.gmra.mxu2 %v4015_v37 }
 0x100   : > { %v1137_v1 = vadd.f32 %v1136_v19, %v1102_v41  ;;  %v1710_v33 = vrot.slane %v1709_v25, 2 }
 0x101   : > { %v1140_v44 = vpop.f32.mrf.mxu3 }
 0x102   : > { %v1666_v63 = vmul.f32 %v1137_v1, %v625_v6  ;;  %v1027_v30 = vpop.f32.mrf.mxu0  ;;  %v1105_v40 = vpop.f32.mrf.mxu2 }
 0x103   : > { %v1064_v54 = vpop.f32.mrf.mxu1  ;;  %v1028_v21 = vadd.f32 %v1027_v30, %v987_v11  ;;  %v1676_v30 = vrot.slane %v1675_v4, 1 }
 0x104   : > { %v1678_v57 = vadd.f32 %v1666_v63, %v1664_v51  ;;  %v1065_v0 = vadd.f32 %v1064_v54, %v1023_v56  ;;  %v1711_v63 = vadd.f32 %v1710_v33, %v1709_v25 }
 0x105   : > { %1972 = vmatmul.f32.gmra.mxu0 %v4079_v45 }
 0x106   : > { %v1679_v50 = vrot.slane %v1678_v57, 4  ;;  %2011 = vmatmul.f32.gmra.mxu1 %v4003_v13  ;;  %2099 = vmatmul.f32.gmra.mxu3 %v4065_v7  ;;  %v1106_v9 = vadd.f32 %v1105_v40, %v1065_v0  ;;  %v3270_v40 = vld [vmem:[%s4110_s25] sm:$0x77]  ;;  %v1712_v61 = vrot.slane %v1711_v63, 1 }
 0x107   : > { %2056 = vmatmul.f32.gmra.mxu2 %v4041_v43 }
 0x108   : > { %v1680_v47 = vadd.f32 %v1679_v50, %v1678_v57  ;;  %v1141_v8 = vadd.f32 %v1140_v44, %v1106_v9  ;;  %v3272_v57 = vmul.f32 0.5, %v3270_v40  ;;  %v4124_v50 = vld [vmem:[%s3615_s8] sm:$0xf] }
 0x109   : > { %v1144_v34 = vpop.f32.mrf.mxu3  ;;  %v3058_v0 = vmul.f32 %v4124_v50, %v4124_v50 }
 0x10a   : > { %v1681_v19 = vrot.slane %v1680_v47, 2  ;;  %v1183_v39 = vpop.f32.mrf.mxu0  ;;  %v1109_v49 = vpop.f32.mrf.mxu2  ;;  %v1700_v48 = vmul.f32 %v1141_v8, %v623_v35  ;;  %v3274_v11 = vadd.f32 0.5, %v3272_v57 }
 0x10b   : > { %v1070_v22 = vpop.f32.mrf.mxu1  ;;  %v3520_v31 = vrot.slane %v3058_v0, 9 }
 0x10c   : > { %v1071_v29 = vadd.f32 %v1070_v22, %v1028_v21  ;;  %v1682_v55 = vadd.f32 %v1681_v19, %v1680_v47  ;;  %v1677_v47 = vadd.f32 %v1676_v30, %v1675_v4  ;;  %v1747_v19 = vperm.slane %v4120_v60, 0  ;;  %3280 = vst [vmem:[#allocation1] ss:$2 sm:$0xff] %v3274_v11 }
 0x10d   : > { %2126 = vmatmul.f32.vlgmr.msrb.gmra.mxu0 %v3931_v3  ;;  %v4149_v30 = vmul.f32 0.125, %v4124_v50 }
 0x10e   : > { %v1110_v14 = vadd.f32 %v1109_v49, %v1071_v29  ;;  %2015 = vmatmul.f32.gmra.mxu1 %v4031_v53  ;;  %2255 = vmatmul.f32.vlgmr.msrb.gmra.mxu3 %v3931_v3  ;;  %v1683_v41 = vrot.slane %v1682_v55, 1  ;;  %v1755_v25 = vadd.f32 %v1747_v19, %v3638_v20  ;;  %v1713_v29 = vadd.f32 %v1712_v61, %v1711_v63 }
 0x10f   : > { %2200 = vmatmul.f32.vlgmr.msrb.gmra.mxu2 %v3991_v58 }
 0x110   : > { %v1145_v24 = vadd.f32 %v1144_v34, %v1110_v14  ;;  %v4114_v35 = vadd.f32 %v1683_v41, %v1682_v55  ;;  %v3070_v14 = vmul.f32 %v1677_v47, %v1677_v47  ;;  %v1759_v33 = vfloor.f32 %v1755_v25 }
 0x111   : > { %v1316_v36 = vpop.f32.mrf.mxu3 }
 0x112   : > { %v1702_v1 = vmul.f32 %v1145_v24, %v625_v6  ;;  %v1191_v44 = vpop.f32.mrf.mxu0  ;;  %v1276_v23 = vpop.f32.mrf.mxu2  ;;  %v548_v6 = vperm.slane %v3744_v52, 1  ;;  %v3021_v20 = vrot.slane %v4114_v35, 6 }
 0x113   : > { %v1238_v51 = vpop.f32.mrf.mxu1 }
 0x114   : > { %v1714_v58 = vadd.f32 %v1702_v1, %v1700_v48  ;;  %v1239_v54 = vadd.f32 %v1238_v51, %v1183_v39  ;;  %v556_v49 = vadd.f32 %v548_v6, %v3629_v12  ;;  %v1763_v48 = vsub.f32 %v1755_v25, %v1759_v33 }
 0x115   : > { %2130 = vmatmul.f32.gmra.mxu0 %v3967_v2  ;;  %v1767_v1 = vperm.slane %v1759_v33, 0  ;;  %v3068_v51 = vadd.f32 %v3520_v31, %v3058_v0 }
 0x116   : > { %v1715_v56 = vrot.slane %v1714_v58, 4  ;;  %2161 = vmatmul.f32.vlgmr.msrb.gmra.mxu1 %v3931_v3  ;;  %2259 = vmatmul.f32.gmra.mxu3 %v3967_v2  ;;  %v1277_v17 = vadd.f32 %v1276_v23, %v1239_v54  ;;  %v4142_v41 = vfloor.f32 %v556_v49  ;;  %v3086_v23 = vmul.f32 %v1713_v29, %v1713_v29 }
 0x117   : > { %2208 = vmatmul.f32.gmra.mxu2 %v4026_v62  ;;  %v3071_v62 = vmul.f32 %v4114_v35, %v4114_v35  ;;  %v1779_v54 = vsub.f32 1.0, %v1763_v48  ;;  %v1811_v57 = vperm.slane %v1763_v48, 0  ;;  %vm4155_vm4 = vcmp.eq.f32.partialorder %v3651_v28, %v1767_v1 }
 0x118   : > { %v1716_v27 = vadd.f32 %v1715_v56, %v1714_v58  ;;  %v4132_v34 = vadd.f32 %v1316_v36, %v1277_v17  ;;  %vm1773_vm7 = vcmp.eq.f32.partialorder %v3655_v32, %v1767_v1 }
 0x119   : > { %v1322_v52 = vpop.f32.mrf.mxu3  ;;  %v3078_v24 = vrot.slane %v3071_v62, 6  ;;  %v1783_v19 = vperm.slane %v1779_v54, 0 }
 0x11a   : > { %v1717_v21 = vrot.slane %v1716_v27, 2  ;;  %v1199_v9 = vpop.f32.mrf.mxu0  ;;  %v1281_v39 = vpop.f32.mrf.mxu2 }
 0x11b   : > { %v1242_v22 = vpop.f32.mrf.mxu1  ;;  %v3080_v6 = vsel %vm3023_vm3, %v3070_v14, %v3078_v24 }
 0x11c   : > { %v1718_v55 = vadd.f32 %v1717_v21, %v1716_v27  ;;  %v1243_v8 = vadd.f32 %v1242_v22, %v1191_v44  ;;  %v1795_v44 = vadd.f32 1.0, %v1759_v33  ;;  %v3024_v27 = vsel %vm3023_vm3, %v1677_v47, %v3021_v20 }
 0x11d   : > { %2134 = vmatmul.f32.gmra.mxu0 %v4003_v13  ;;  %v3084_v25 = vadd.f32 %v3080_v6, %v3068_v51  ;;  %v1791_v47 = vsel %vm4155_vm4, %v1783_v19, 0.0 }
 0x11e   : > { %v1719_v4 = vrot.slane %v1718_v55, 1  ;;  %v1282_v36 = vadd.f32 %v1281_v39, %v1243_v8  ;;  %2165 = vmatmul.f32.gmra.mxu1 %v3967_v2  ;;  %2263 = vmatmul.f32.gmra.mxu3 %v4003_v13  ;;  %v1799_v56 = vperm.slane %v1795_v44, 0  ;;  %v3226_v8 = vperm.slane %v4149_v30, 2 }
 0x11f   : > { %2216 = vmatmul.f32.gmra.mxu2 %v4062_v16 }
 0x120   : > { %v1720_v63 = vadd.f32 %v1719_v4, %v1718_v55  ;;  %v4146_v58 = vadd.f32 %v1322_v52, %v1282_v36  ;;  %v4161_v52 = vsub.f32 %v556_v49, %v4142_v41  ;;  %vm1807_vm5 = vcmp.eq.f32.partialorder %v3651_v28, %v1799_v56 }
 0x121   : > { %v1328_v40 = vpop.f32.mrf.mxu3  ;;  %v1819_v22 = vsel %vm1807_vm5, %v1811_v57, 0.0  ;;  %v3225_v55 = vperm.slane %v4149_v30, 0  ;;  %vm1805_vm8 = vcmp.eq.f32.partialorder %v3655_v32, %v1799_v56 }
 0x122   : > { %v3034_v35 = vrot.slane %v1720_v63, 6  ;;  %v3087_v17 = vmul.f32 %v1720_v63, %v1720_v63  ;;  %v4152_v16 = vpop.f32.mrf.mxu0  ;;  %v1286_v61 = vpop.f32.mrf.mxu2  ;;  %v1817_v51 = vsel %vm1805_vm8, %v1811_v57, 0.0  ;;  %v3234_v63 = vperm.slane %v4149_v30, 3 }
 0x123   : > { %v1246_v11 = vpop.f32.mrf.mxu1  ;;  %v3252_v57 = vsel %vm3251_vm6, %v4128_v46, %v3225_v55  ;;  %v580_v46 = vsub.f32 1.0, %v4161_v52 }
 0x124   : > { %v3036_v62 = vsel %vm3023_vm3, %v1713_v29, %v3034_v35  ;;  %v3094_v21 = vrot.slane %v3087_v17, 6  ;;  %v1247_v39 = vadd.f32 %v1246_v11, %v1199_v9  ;;  %v1827_v9 = vadd.f32 %v1819_v22, %v1791_v47 }
 0x125   : > { %v3038_v31 = vrot.slane %v3036_v62, 7  ;;  %2138 = vmatmul.f32.gmra.mxu0 %v4031_v53  ;;  %v3028_v29 = vadd.f32 %v4124_v50, %v3024_v27  ;;  %v596_v17 = vadd.f32 1.0, %v4142_v41 }
 0x126   : > { %v3096_v49 = vsel %vm3023_vm3, %v3086_v23, %v3094_v21  ;;  %v1287_v14 = vadd.f32 %v1286_v61, %v1247_v39  ;;  %2169 = vmatmul.f32.gmra.mxu1 %v4003_v13  ;;  %2267 = vmatmul.f32.gmra.mxu3 %v4031_v53  ;;  %v4178_v36 = vand.u32 4294901760, %v1827_v9  ;;  %v1789_v23 = vsel %vm1773_vm7, %v1783_v19, 0.0 }
 0x127   : > { %v3042_v33 = vadd.f32 %v4124_v50, %v3038_v31  ;;  %v3100_v24 = vadd.f32 %v3096_v49, %v3084_v25  ;;  %2224 = vmatmul.f32.gmra.mxu2 %v4079_v45  ;;  %v3233_v50 = vperm.slane %v4149_v30, 1  ;;  %v1825_v1 = vadd.f32 %v1817_v51, %v1789_v23 }
 0x128   : > { %v4176_v4 = vadd.f32 %v1328_v40, %v1287_v14  ;;  %v2507_v40 = vsub.f32 %v1827_v9, %v4178_v36  ;;  %2456 = vmatpush.msrb.mxu0 %v4178_v36  ;;  %2591 = vmatpush.msrb.mxu3 %v4178_v36  ;;  %v3044_v56 = vmul.f32 %v3028_v29, %v3028_v29  ;;  %v3557_v39 = vmov 0.0   ;;  %v1739_v29 = vld [vmem:[%s3898_s17 + $0x20] sm:$0xff] }
 0x129   : > { %v3046_v20 = vmul.f32 %v3042_v33, %v3042_v33  ;;  %v3102_v48 = vmul.f32 0.01, %v3100_v24  ;;  %v4182_v44 = vpop.f32.mrf.mxu3  ;;  %v3253_v30 = vsel %vm3251_vm6, %v4130_v5, %v3226_v8  ;;  %v4200_v0 = vand.u32 4294901760, %v1825_v1 }
 0x12a   : > { %v4186_v54 = vpop.f32.mrf.mxu0  ;;  %v4188_v45 = vpop.f32.mrf.mxu2  ;;  %2551 = vmatpush.msrb.mxu2 %v2507_v40  ;;  %v2508_v61 = vand.u32 4294901760, %v2507_v40  ;;  %v3257_v19 = vsel %vm3256_vm9, %v3252_v57, %v3233_v50  ;;  %v3258_v21 = vsel %vm3256_vm9, %v3253_v30, %v3234_v63  ;;  %v600_v25 = vperm.slane %v596_v17, 0 }
 0x12b   : > { %v3518_v6 = vrot.slane %v3046_v20, 9  ;;  %v4195_v35 = vpop.f32.mrf.mxu1  ;;  %v3104_v11 = vadd.f32 0.5, %v3102_v48  ;;  %v2513_v62 = vsub.f32 %v1825_v1, %v4200_v0  ;;  %2458 = vmatpush.msrb.mxu0 %v4200_v0  ;;  %2593 = vmatpush.msrb.mxu3 %v4200_v0  ;;  %v584_v8 = vperm.slane %v580_v46, 0 }
 0x12c   : > { %v2509_v5 = vsub.f32 %v2507_v40, %v2508_v61  ;;  %v612_v48 = vperm.slane %v4161_v52, 0  ;;  %vm606_vm13 = vcmp.eq.f32.partialorder %v3655_v32, %v600_v25  ;;  %vm608_vm15 = vcmp.eq.f32.partialorder %v3651_v28, %v600_v25 }
 0x12d   : > { %v3056_v27 = vadd.f32 %v3518_v6, %v3044_v56  ;;  %2293 = vmatmul.f32.vlgmr.msra.gmra.mxu0 %v3946_v42  ;;  %v568_v42 = vperm.slane %v4142_v41, 0  ;;  %2554 = vmatpush.msrb.mxu2 %v2513_v62  ;;  %v2514_v55 = vand.u32 4294901760, %v2513_v62  ;;  %v2430_v63 = vsel %vm630_vm0, %v1739_v29, 0 }
 0x12e   : > { %2173 = vmatmul.f32.gmra.mxu1 %v4031_v53  ;;  %2413 = vmatmul.f32.vlgmr.msra.gmra.mxu3 %v3931_v3  ;;  %v2510_v31 = vand.u32 4294901760, %v2509_v5  ;;  %v618_v40 = vsel %vm606_vm13, %v612_v48, 0.0  ;;  %v620_v56 = vsel %vm608_vm15, %v612_v48, 0.0  ;;  %v1362_v6 = vadd.f32 %v4186_v54, %v4132_v34 }
 0x12f   : > { %vm3106_vm10 = vcmp.lt.f32.partialorder %v3056_v27, %v3104_v11  ;;  %2378 = vmatmul.f32.vlgmr.msra.gmra.mxu2 %v3931_v3  ;;  %2636 = vmatpush.msra.mxu0 %v2508_v61  ;;  %v2515_v9 = vsub.f32 %v2513_v62, %v2514_v55  ;;  %vm4230_vm12 = vcmp.eq.f32.partialorder %v3655_v32, %v568_v42  ;;  %v4256_v57 = vand.u32 4294901760, %v2430_v63 }
 0x130   : > { %v3108_v22 = vsel %vm3106_vm10, 1.0, %v3557_v39  ;;  %2511 = vmatpush.msrb.mxu1 %v2510_v31  ;;  %vm4238_vm14 = vcmp.eq.f32.partialorder %v3651_v28, %v568_v42  ;;  %v590_v52 = vsel %vm4230_vm12, %v584_v8, 0.0  ;;  %v1251_v42 = vadd.f32 %v4195_v35, %v4152_v16  ;;  %v4296_v16 = vld [vmem:[%s3615_s8 + $0x4] sm:$0xf] }
 0x131   : > { %v3243_v3 = vperm.slane %v3108_v22, 0  ;;  %v3244_v41 = vperm.slane %v3108_v22, 2  ;;  %v4222_v47 = vpop.f32.mrf.mxu3  ;;  %2640 = vmatpush.msra.mxu0 %v2514_v55  ;;  %v2516_v50 = vand.u32 4294901760, %v2515_v9  ;;  %v592_v1 = vsel %vm4238_vm14, %v584_v8, 0.0 }
 0x132   : > { %v1365_v49 = vpop.f32.mrf.mxu0  ;;  %v4224_v14 = vpop.f32.mrf.mxu2  ;;  %v4263_v17 = vadd.f32 %v618_v40, %v590_v52  ;;  %v4265_v11 = vadd.f32 %v620_v56, %v592_v1  ;;  %v4272_v46 = vsub.f32 %v2430_v63, %v4256_v57  ;;  %v1292_v20 = vadd.f32 %v4188_v45, %v1251_v42 }
 0x133   : > { %v3262_v33 = vsel %vm3261_vm11, %v3257_v19, %v3243_v3  ;;  %v3263_v24 = vsel %vm3261_vm11, %v3258_v21, %v3244_v41  ;;  %v1396_v23 = vpop.f32.mrf.mxu1  ;;  %2517 = vmatpush.msrb.mxu1 %v2516_v50  ;;  %v1740_v19 = vld [vmem:[%s3898_s17 + $0x28] sm:$0xff] }
 0x134   : > { %3266 = vst [vmem:[%s4220_s30] sm:$0x3f] %v3262_v33  ;;  %v1397_v61 = vadd.f32 %v1396_v23, %v1362_v6  ;;  %v4286_v31 = vand.u32 4294901760, %v4272_v46  ;;  %v1335_v40 = vadd.f32 %v4182_v44, %v1292_v20 }
 0x135   : > { %3267 = vst [vmem:[%s4220_s30 + $0x8] sm:$0x3f] %v3263_v24  ;;  %2298 = vmatmul.f32.gmra.mxu0 %v3982_v59  ;;  %v1748_v59 = vperm.slane %v4120_v60, 2  ;;  %v1741_v24 = vld [vmem:[%s3898_s17 + $0x30] sm:$0xff] }
 0x136   : > { %2333 = vmatmul.f32.vlgmr.msra.gmra.mxu1 %v3956_v38  ;;  %2417 = vmatmul.f32.gmra.mxu3 %v3967_v2  ;;  %v1667_v5 = vmul.f32 %v1397_v61, %v4263_v17  ;;  %v2462_v48 = vsub.f32 %v4272_v46, %v4286_v31  ;;  %v2436_v63 = vsel %vm630_vm0, %v1741_v24, 0 }
 0x137   : > { %2382 = vmatmul.f32.gmra.mxu2 %v3967_v2  ;;  %2673 = vmatpush.msra.mxu1 %v4178_v36  ;;  %v1756_v30 = vadd.f32 %v1748_v59, %v3647_v26  ;;  %v1366_v2 = vadd.f32 %v1365_v49, %v4146_v58  ;;  %v2433_v58 = vsel %vm630_vm0, %v1740_v19, 0 }
 0x138   : > { %v4299_v35 = vand.u32 4294901760, %v2433_v58  ;;  %v4329_v6 = vand.u32 4294901760, %v2462_v48 }
 0x139   : > { %v4259_v38 = vpop.f32.mrf.mxu3  ;;  %2675 = vmatpush.msra.mxu1 %v4200_v0  ;;  %v1760_v54 = vfloor.f32 %v1756_v30 }
 0x13a   : > { %v1369_v27 = vpop.f32.mrf.mxu0  ;;  %v4267_v60 = vpop.f32.mrf.mxu2  ;;  %v4313_v50 = vsub.f32 %v2433_v58, %v4299_v35 }
 0x13b   : > { %v1400_v34 = vpop.f32.mrf.mxu1  ;;  %v1764_v26 = vsub.f32 %v1756_v30, %v1760_v54  ;;  %v1768_v0 = vperm.slane %v1760_v54, 0  ;;  %v1796_v21 = vadd.f32 1.0, %v1760_v54  ;;  %v1370_v1 = vadd.f32 %v1369_v27, %v4176_v4  ;;  %v1742_v54 = vld [vmem:[%s3898_s17 + $0x38] sm:$0xff] }
 0x13c   : > { %v1401_v36 = vadd.f32 %v1400_v34, %v1366_v2  ;;  %v4334_v2 = vand.u32 4294901760, %v4313_v50  ;;  %v2439_v42 = vsel %vm630_vm0, %v1742_v54, 0 }
 0x13d   : > { %2303 = vmatmul.f32.gmra.mxu0 %v4015_v37  ;;  %v1780_v37 = vsub.f32 1.0, %v1764_v26  ;;  %v1812_v22 = vperm.slane %v1764_v26, 0  ;;  %vm4289_vm1 = vcmp.eq.f32.partialorder %v3651_v28, %v1768_v0  ;;  %v1800_v55 = vperm.slane %v1796_v21, 0 }
 0x13e   : > { %v1669_v62 = vmul.f32 %v1401_v36, %v4265_v11  ;;  %2339 = vmatmul.f32.gmra.mxu1 %v4001_v10  ;;  %2421 = vmatmul.f32.gmra.mxu3 %v4003_v13  ;;  %vm1774_vm4 = vcmp.eq.f32.partialorder %v3655_v32, %v1768_v0  ;;  %v2470_v0 = vsub.f32 %v4313_v50, %v4334_v2 }
 0x13f   : > { %2386 = vmatmul.f32.gmra.mxu2 %v4003_v13  ;;  %v1784_v41 = vperm.slane %v1780_v37, 0  ;;  %v549_v13 = vperm.slane %v4296_v16, 3  ;;  %vm1808_vm2 = vcmp.eq.f32.partialorder %v3651_v28, %v1800_v55  ;;  %vm1806_vm5 = vcmp.eq.f32.partialorder %v3655_v32, %v1800_v55 }
 0x140   : > { %v4283_v25 = vadd.f32 %v1669_v62, %v1667_v5  ;;  %v1820_v33 = vsel %vm1808_vm2, %v1812_v22, 0.0 }
 0x141   : > { %v4293_v3 = vpop.f32.mrf.mxu3  ;;  %v1792_v29 = vsel %vm4289_vm1, %v1784_v41, 0.0  ;;  %v557_v51 = vadd.f32 %v549_v13, %v3636_v18  ;;  %v1790_v52 = vsel %vm1774_vm4, %v1784_v41, 0.0 }
 0x142   : > { %v1373_v49 = vpop.f32.mrf.mxu0  ;;  %v4301_v8 = vpop.f32.mrf.mxu2  ;;  %v1828_v23 = vadd.f32 %v1820_v33, %v1792_v29  ;;  %v1491_v29 = vadd.f32 %v4222_v47, %v4224_v14 }
 0x143   : > { %v1404_v9 = vpop.f32.mrf.mxu1  ;;  %v4331_v30 = vfloor.f32 %v557_v51  ;;  %v1374_v44 = vadd.f32 %v1373_v49, %v1335_v40 }
 0x144   : > { %v4319_v45 = vand.u32 4294901760, %v1828_v23  ;;  %v1405_v61 = vadd.f32 %v1404_v9, %v1370_v1 }
 0x145   : > { %2308 = vmatmul.f32.gmra.mxu0 %v4041_v43  ;;  %v1818_v43 = vsel %vm1806_vm5, %v1812_v22, 0.0  ;;  %v4343_v62 = vsub.f32 %v557_v51, %v4331_v30  ;;  %v597_v41 = vadd.f32 1.0, %v4331_v30  ;;  %v569_v51 = vperm.slane %v4331_v30, 0 }
 0x146   : > { %2345 = vmatmul.f32.gmra.mxu1 %v4029_v15  ;;  %2425 = vmatmul.f32.gmra.mxu3 %v4031_v53  ;;  %v2759_v56 = vsub.f32 %v1828_v23, %v4319_v45  ;;  %v1826_v15 = vadd.f32 %v1818_v43, %v1790_v52  ;;  %v1703_v37 = vmul.f32 %v1405_v61, %v4263_v17  ;;  %v4359_v17 = vand.u32 4294901760, %v2470_v0 }
 0x147   : > { %2390 = vmatmul.f32.gmra.mxu2 %v4031_v53  ;;  %v4336_v53 = vand.u32 4294901760, %v2436_v63  ;;  %v581_v20 = vsub.f32 1.0, %v4343_v62  ;;  %v613_v1 = vperm.slane %v4343_v62, 0  ;;  %vm4381_vm0 = vcmp.eq.f32.partialorder %v3655_v32, %v569_v51 }
 0x148   : > { %2708 = vmatpush.msra.mxu2 %v4319_v45  ;;  %v2760_v27 = vand.u32 4294901760, %v2759_v56  ;;  %v2709_v34 = vand.u32 4294901760, %v1826_v15  ;;  %vm4391_vm8 = vcmp.eq.f32.partialorder %v3651_v28, %v569_v51  ;;  %v3203_v51 = vld [vmem:[%s4086_s21 + $0x8] sm:$0x77] }
 0x149   : > { %v4327_v59 = vpop.f32.mrf.mxu3  ;;  %v4348_v21 = vsub.f32 %v2436_v63, %v4336_v53  ;;  %v601_v63 = vperm.slane %v597_v41, 0  ;;  %v585_v14 = vperm.slane %v581_v20, 0 }
 0x14a   : > { %v1528_v19 = vpop.f32.mrf.mxu0  ;;  %v4338_v4 = vpop.f32.mrf.mxu2  ;;  %v2761_v58 = vsub.f32 %v2759_v56, %v2760_v27  ;;  %2710 = vmatpush.msra.mxu2 %v2709_v34  ;;  %v2765_v5 = vsub.f32 %v1826_v15, %v2709_v34  ;;  %v1495_v15 = vadd.f32 %v4259_v38, %v4267_v60 }
 0x14b   : > { %v1408_v36 = vpop.f32.mrf.mxu1  ;;  %v1529_v52 = vadd.f32 %v1528_v19, %v1491_v29  ;;  %vm607_vm7 = vcmp.eq.f32.partialorder %v3655_v32, %v601_v63  ;;  %vm609_vm10 = vcmp.eq.f32.partialorder %v3651_v28, %v601_v63  ;;  %v591_v38 = vsel %vm4381_vm0, %v585_v14, 0.0 }
 0x14c   : > { %v1409_v26 = vadd.f32 %v1408_v36, %v1374_v44  ;;  %v2762_v10 = vand.u32 4294901760, %v2761_v58  ;;  %v2766_v55 = vand.u32 4294901760, %v2765_v5  ;;  %v619_v60 = vsel %vm607_vm7, %v613_v1, 0.0 }
 0x14d   : > { %2464 = vmatmul.f32.vlgmr.msrb.gmra.mxu0 %v4329_v6  ;;  %v593_v58 = vsel %vm4391_vm8, %v585_v14, 0.0  ;;  %v627_v0 = vadd.f32 %v619_v60, %v591_v38 }
 0x14e   : > { %v1705_v22 = vmul.f32 %v1409_v26, %v4265_v11  ;;  %2351 = vmatmul.f32.gmra.mxu1 %v4065_v7  ;;  %2597 = vmatmul.f32.vlgmr.msrb.gmra.mxu3 %v4286_v31  ;;  %v2767_v49 = vsub.f32 %v2765_v5, %v2766_v55  ;;  %v4362_v11 = vand.u32 4294901760, %v4348_v21  ;;  %v4364_v7 = vand.u32 4294901760, %v2439_v42 }
 0x14f   : > { %2557 = vmatmul.f32.vlgmr.msrb.gmra.mxu2 %v4272_v46  ;;  %2803 = vmatpush.msrb.mxu0 %v2759_v56 }
 0x150   : > { %v4357_v13 = vadd.f32 %v1705_v22, %v1703_v37  ;;  %2763 = vmatpush.msra.mxu3 %v2762_v10  ;;  %2888 = vmatpush.msrb.mxu2 %v2760_v27  ;;  %v2768_v48 = vand.u32 4294901760, %v2767_v49  ;;  %v2478_v43 = vsub.f32 %v4348_v21, %v4362_v11  ;;  %v4374_v40 = vsub.f32 %v2439_v42, %v4364_v7 }
 0x151   : > { %v1648_v9 = vpop.f32.mrf.mxu3  ;;  %2806 = vmatpush.msrb.mxu0 %v2765_v5  ;;  %v621_v5 = vsel %vm609_vm10, %v613_v1, 0.0  ;;  %v1499_v49 = vadd.f32 %v4293_v3, %v4301_v8  ;;  %v1686_v3 = vrot.slane %v4283_v25, 4  ;;  %v1503_v8 = vadd.f32 %v4327_v59, %v4338_v4 }
 0x152   : > { %v1533_v33 = vpop.f32.mrf.mxu0  ;;  %v1613_v24 = vpop.f32.mrf.mxu2  ;;  %2892 = vmatpush.msrb.mxu2 %v2766_v55  ;;  %2769 = vmatpush.msra.mxu3 %v2768_v48  ;;  %v4396_v61 = vand.u32 4294901760, %v2478_v43  ;;  %v4399_v19 = vand.u32 4294901760, %v4374_v40  ;;  %v629_v22 = vadd.f32 %v621_v5, %v593_v58  ;;  %v3205_v43 = vmul.f32 0.5, %v3203_v51 }
 0x153   : > { %v1568_v23 = vpop.f32.mrf.mxu1  ;;  %v1534_v27 = vadd.f32 %v1533_v33, %v1495_v15  ;;  %v1687_v60 = vadd.f32 %v1686_v3, %v4283_v25 }
 0x154   : > { %2925 = vmatpush.msrb.mxu3 %v4319_v45  ;;  %v1569_v47 = vadd.f32 %v1568_v23, %v1529_v52  ;;  %v3207_v14 = vadd.f32 0.5, %v3205_v43 }
 0x155   : > { %2472 = vmatmul.f32.gmra.mxu0 %v4359_v17  ;;  %v1688_v58 = vrot.slane %v1687_v60, 2 }
 0x156   : > { %2519 = vmatmul.f32.vlgmr.msrb.gmra.mxu1 %v4256_v57  ;;  %2603 = vmatmul.f32.gmra.mxu3 %v4334_v2  ;;  %3216 = vst [vmem:[#allocation1 + $0x10] ss:$2 sm:$0xff] %v3207_v14 }
 0x157   : > { %2562 = vmatmul.f32.gmra.mxu2 %v4313_v50  ;;  %2843 = vmatpush.msrb.mxu1 %v4319_v45  ;;  %v1614_v45 = vadd.f32 %v1613_v24, %v1569_v47 }
 0x158   : > { %2927 = vmatpush.msrb.mxu3 %v2709_v34 }
 0x159   : > { %v1652_v44 = vpop.f32.mrf.mxu3  ;;  %2845 = vmatpush.msrb.mxu1 %v2709_v34  ;;  %v2486_v34 = vsub.f32 %v4374_v40, %v4399_v19  ;;  %v1649_v42 = vadd.f32 %v1648_v9, %v1614_v45  ;;  %v1722_v45 = vrot.slane %v4357_v13, 4 }
 0x15a   : > { %v1538_v54 = vpop.f32.mrf.mxu0  ;;  %v1617_v36 = vpop.f32.mrf.mxu2 }
 0x15b   : > { %v1574_v26 = vpop.f32.mrf.mxu1  ;;  %v4411_v41 = vand.u32 4294901760, %v2486_v34  ;;  %v1668_v29 = vmul.f32 %v1649_v42, %v627_v0  ;;  %v1539_v48 = vadd.f32 %v1538_v54, %v1499_v49  ;;  %v1723_v4 = vadd.f32 %v1722_v45, %v4357_v13 }
 0x15c   : > { %v1575_v62 = vadd.f32 %v1574_v26, %v1534_v27 }
 0x15d   : > { %2480 = vmatmul.f32.gmra.mxu0 %v4396_v61  ;;  %v1724_v49 = vrot.slane %v1723_v4, 2  ;;  %v4439_v43 = vld.sshfl [vmem:[#allocation1 + $0x18] sm:$0xff pattern:$0x75316420] }
 0x15e   : > { %v1618_v37 = vadd.f32 %v1617_v36, %v1575_v62  ;;  %2523 = vmatmul.f32.gmra.mxu1 %v4299_v35  ;;  %2609 = vmatmul.f32.gmra.mxu3 %v4362_v11 }
 0x15f   : > { %2567 = vmatmul.f32.gmra.mxu2 %v4348_v21 }
 0x160   : > { %v1653_v10 = vadd.f32 %v1652_v44, %v1618_v37 }
 0x161   : > { %v1656_v55 = vpop.f32.mrf.mxu3 }
 0x162   : > { %v1670_v33 = vmul.f32 %v1653_v10, %v629_v22  ;;  %v1543_v24 = vpop.f32.mrf.mxu0  ;;  %v1621_v9 = vpop.f32.mrf.mxu2 }
 0x163   : > { %v1580_v20 = vpop.f32.mrf.mxu1  ;;  %v1544_v15 = vadd.f32 %v1543_v24, %v1503_v8  ;;  %v3271_v24 = vld [vmem:[%s4110_s25 + $0x8] sm:$0x77] }
 0x164   : > { %v1692_v23 = vadd.f32 %v1670_v33, %v1668_v29  ;;  %v1581_v52 = vadd.f32 %v1580_v20, %v1539_v48  ;;  %v1689_v29 = vadd.f32 %v1688_v58, %v1687_v60  ;;  %v3273_v48 = vmul.f32 0.5, %v3271_v24 }
 0x165   : > { %2488 = vmatmul.f32.gmra.mxu0 %v4411_v41 }
 0x166   : > { %v1693_v63 = vrot.slane %v1692_v23, 4  ;;  %2527 = vmatmul.f32.gmra.mxu1 %v4336_v53  ;;  %2615 = vmatmul.f32.gmra.mxu3 %v4399_v19  ;;  %v1622_v30 = vadd.f32 %v1621_v9, %v1581_v52  ;;  %v3275_v51 = vadd.f32 0.5, %v3273_v48  ;;  %v4437_v52 = vld.sshfl [vmem:[#allocation1 + $0x10] sm:$0xff pattern:$0x75316420] }
 0x167   : > { %2572 = vmatmul.f32.gmra.mxu2 %v4374_v40 }
 0x168   : > { %v1694_v47 = vadd.f32 %v1693_v63, %v1692_v23  ;;  %v1657_v26 = vadd.f32 %v1656_v55, %v1622_v30  ;;  %v3059_v63 = vmul.f32 %v4296_v16, %v4296_v16  ;;  %3284 = vst [vmem:[#allocation1 + $0x10] ss:$2 sm:$0xff] %v3275_v51 }
 0x169   : > { %v1660_v1 = vpop.f32.mrf.mxu3 }
 0x16a   : > { %v1695_v56 = vrot.slane %v1694_v47, 2  ;;  %v1949_v44 = vpop.f32.mrf.mxu0  ;;  %v1625_v27 = vpop.f32.mrf.mxu2  ;;  %v1704_v25 = vmul.f32 %v1657_v26, %v627_v0  ;;  %v3521_v45 = vrot.slane %v3059_v63, 9  ;;  %v4448_v26 = vld [vmem:[%s3851_s14] sm:$0xf] }
 0x16b   : > { %v1586_v38 = vpop.f32.mrf.mxu1 }
 0x16c   : > { %v1587_v54 = vadd.f32 %v1586_v38, %v1544_v15  ;;  %v1696_v36 = vadd.f32 %v1695_v56, %v1694_v47 }
 0x16d   : > { %2642 = vmatmul.f32.vlgmr.msra.gmra.mxu0 %v4256_v57 }
 0x16e   : > { %v1626_v59 = vadd.f32 %v1625_v27, %v1587_v54  ;;  %2531 = vmatmul.f32.gmra.mxu1 %v4364_v7  ;;  %2771 = vmatmul.f32.vlgmr.msra.gmra.mxu3 %v4256_v57  ;;  %v1697_v34 = vrot.slane %v1696_v36, 1 }
 0x16f   : > { %2716 = vmatmul.f32.vlgmr.msra.gmra.mxu2 %v4329_v6  ;;  %v1725_v6 = vadd.f32 %v1724_v49, %v1723_v4 }
 0x170   : > { %v1661_v5 = vadd.f32 %v1660_v1, %v1626_v59  ;;  %v1698_v20 = vadd.f32 %v1697_v34, %v1696_v36  ;;  %v1829_v59 = vperm.slane %v4448_v26, 1  ;;  %v3069_v34 = vadd.f32 %v3521_v45, %v3059_v63 }
 0x171   : > { %v2082_v62 = vpop.f32.mrf.mxu3 }
 0x172   : > { %v1706_v42 = vmul.f32 %v1661_v5, %v629_v22  ;;  %v1957_v37 = vpop.f32.mrf.mxu0  ;;  %v2042_v10 = vpop.f32.mrf.mxu2  ;;  %v1690_v22 = vrot.slane %v1689_v29, 1  ;;  %v3073_v47 = vmul.f32 %v1698_v20, %v1698_v20  ;;  %v3022_v58 = vrot.slane %v1698_v20, 6 }
 0x173   : > { %v2004_v55 = vpop.f32.mrf.mxu1 }
 0x174   : > { %v1728_v33 = vadd.f32 %v1706_v42, %v1704_v25  ;;  %v2005_v9 = vadd.f32 %v2004_v55, %v1949_v44  ;;  %v1691_v30 = vadd.f32 %v1690_v22, %v1689_v29  ;;  %v3079_v38 = vrot.slane %v3073_v47, 6 }
 0x175   : > { %2646 = vmatmul.f32.gmra.mxu0 %v4299_v35 }
 0x176   : > { %v1729_v13 = vrot.slane %v1728_v33, 4  ;;  %2677 = vmatmul.f32.vlgmr.msra.gmra.mxu1 %v4256_v57  ;;  %2775 = vmatmul.f32.gmra.mxu3 %v4299_v35  ;;  %v2043_v0 = vadd.f32 %v2042_v10, %v2005_v9  ;;  %v3072_v4 = vmul.f32 %v1691_v30, %v1691_v30  ;;  %v3025_v24 = vsel %vm3023_vm3, %v1691_v30, %v3022_v58 }
 0x177   : > { %2724 = vmatmul.f32.gmra.mxu2 %v4359_v17  ;;  %v1726_v17 = vrot.slane %v1725_v6, 1  ;;  %v3029_v51 = vadd.f32 %v4296_v16, %v3025_v24 }
 0x178   : > { %v1730_v23 = vadd.f32 %v1729_v13, %v1728_v33  ;;  %v4441_v3 = vadd.f32 %v2082_v62, %v2043_v0  ;;  %v3081_v42 = vsel %vm3023_vm3, %v3072_v4, %v3079_v38  ;;  %v1837_v33 = vadd.f32 %v1829_v59, %v3629_v12 }
 0x179   : > { %v2088_v8 = vpop.f32.mrf.mxu3  ;;  %v1727_v36 = vadd.f32 %v1726_v17, %v1725_v6  ;;  %v3085_v48 = vadd.f32 %v3081_v42, %v3069_v34  ;;  %v3209_v0 = vmul.f32 0.125, %v4296_v16  ;;  %v3045_v45 = vmul.f32 %v3029_v51, %v3029_v51 }
 0x17a   : > { %v1731_v14 = vrot.slane %v1730_v23, 2  ;;  %v1965_v1 = vpop.f32.mrf.mxu0  ;;  %v2047_v56 = vpop.f32.mrf.mxu2  ;;  %v1841_v47 = vfloor.f32 %v1837_v33 }
 0x17b   : > { %v2008_v15 = vpop.f32.mrf.mxu1  ;;  %v3088_v29 = vmul.f32 %v1727_v36, %v1727_v36  ;;  %v3227_v17 = vperm.slane %v3209_v0, 0 }
 0x17c   : > { %v1732_v44 = vadd.f32 %v1731_v14, %v1730_v23  ;;  %v2009_v27 = vadd.f32 %v2008_v15, %v1957_v37  ;;  %v3228_v15 = vperm.slane %v3209_v0, 2  ;;  %v1877_v59 = vadd.f32 1.0, %v1841_v47 }
 0x17d   : > { %2650 = vmatmul.f32.gmra.mxu0 %v4336_v53  ;;  %v3254_v58 = vsel %vm3251_vm6, %v4437_v52, %v3227_v17  ;;  %v1849_v34 = vperm.slane %v1841_v47, 0 }
 0x17e   : > { %v1733_v60 = vrot.slane %v1732_v44, 1  ;;  %v2048_v54 = vadd.f32 %v2047_v56, %v2009_v27  ;;  %2681 = vmatmul.f32.gmra.mxu1 %v4299_v35  ;;  %2779 = vmatmul.f32.gmra.mxu3 %v4336_v53 }
 0x17f   : > { %2732 = vmatmul.f32.gmra.mxu2 %v4396_v61  ;;  %vm4492_vm13 = vcmp.eq.f32.partialorder %v3655_v32, %v1849_v34  ;;  %vm4498_vm15 = vcmp.eq.f32.partialorder %v3651_v28, %v1849_v34 }
 0x180   : > { %v1734_v5 = vadd.f32 %v1733_v60, %v1732_v44  ;;  %v4451_v62 = vadd.f32 %v2088_v8, %v2048_v54  ;;  %v1845_v54 = vsub.f32 %v1837_v33, %v1841_v47 }
 0x181   : > { %v2094_v25 = vpop.f32.mrf.mxu3 }
 0x182   : > { %v3035_v37 = vrot.slane %v1734_v5, 6  ;;  %v3089_v10 = vmul.f32 %v1734_v5, %v1734_v5  ;;  %v4454_v49 = vpop.f32.mrf.mxu0  ;;  %v2052_v55 = vpop.f32.mrf.mxu2  ;;  %v3255_v5 = vsel %vm3251_vm6, %v4439_v43, %v3228_v15 }
 0x183   : > { %v2012_v61 = vpop.f32.mrf.mxu1 }
 0x184   : > { %v3037_v9 = vsel %vm3023_vm3, %v1727_v36, %v3035_v37  ;;  %v3095_v20 = vrot.slane %v3089_v10, 6  ;;  %v2013_v13 = vadd.f32 %v2012_v61, %v1965_v1  ;;  %v3236_v36 = vperm.slane %v3209_v0, 3 }
 0x185   : > { %v3039_v6 = vrot.slane %v3037_v9, 7  ;;  %2654 = vmatmul.f32.gmra.mxu0 %v4364_v7  ;;  %v1881_v10 = vperm.slane %v1877_v59, 0  ;;  %v1893_v9 = vperm.slane %v1845_v54, 0 }
 0x186   : > { %v3097_v22 = vsel %vm3023_vm3, %v3088_v29, %v3095_v20  ;;  %v2053_v23 = vadd.f32 %v2052_v55, %v2013_v13  ;;  %2685 = vmatmul.f32.gmra.mxu1 %v4336_v53  ;;  %2783 = vmatmul.f32.gmra.mxu3 %v4364_v7  ;;  %v3260_v52 = vsel %vm3256_vm9, %v3255_v5, %v3236_v36  ;;  %v1830_v36 = vperm.slane %v4448_v26, 3 }
 0x187   : > { %v3043_v63 = vadd.f32 %v4296_v16, %v3039_v6  ;;  %v3101_v8 = vadd.f32 %v3097_v22, %v3085_v48  ;;  %2740 = vmatmul.f32.gmra.mxu2 %v4411_v41  ;;  %v3235_v16 = vperm.slane %v3209_v0, 1  ;;  %vm1885_vm14 = vcmp.eq.f32.partialorder %v3655_v32, %v1881_v10 }
 0x188   : > { %v4467_v14 = vadd.f32 %v2094_v25, %v2053_v23  ;;  %v1861_v25 = vsub.f32 1.0, %v1845_v54  ;;  %vm1887_vm1 = vcmp.eq.f32.partialorder %v3651_v28, %v1881_v10  ;;  %v1897_v0 = vsel %vm1885_vm14, %v1893_v9, 0.0 }
 0x189   : > { %v3047_v1 = vmul.f32 %v3043_v63, %v3043_v63  ;;  %v3103_v56 = vmul.f32 0.01, %v3101_v8  ;;  %v4469_v30 = vpop.f32.mrf.mxu3  ;;  %v3259_v37 = vsel %vm3256_vm9, %v3254_v58, %v3235_v16  ;;  %v1899_v23 = vsel %vm1887_vm1, %v1893_v9, 0.0 }
 0x18a   : > { %v2127_v44 = vpop.f32.mrf.mxu0  ;;  %v4471_v27 = vpop.f32.mrf.mxu2  ;;  %v1865_v24 = vperm.slane %v1861_v25, 0 }
 0x18b   : > { %v3519_v38 = vrot.slane %v3047_v1, 9  ;;  %v2016_v60 = vpop.f32.mrf.mxu1  ;;  %v3105_v4 = vadd.f32 0.5, %v3103_v56  ;;  %v2128_v51 = vadd.f32 %v2127_v44, %v4441_v3 }
 0x18c   : > { %v1869_v6 = vsel %vm4492_vm13, %v1865_v24, 0.0  ;;  %v1871_v22 = vsel %vm4498_vm15, %v1865_v24, 0.0  ;;  %v2017_v3 = vadd.f32 %v2016_v60, %v4454_v49 }
 0x18d   : > { %v3057_v41 = vadd.f32 %v3519_v38, %v3045_v45  ;;  %2809 = vmatmul.f32.vlgmr.msrb.gmra.mxu0 %v4272_v46  ;;  %v1907_v1 = vadd.f32 %v1899_v23, %v1871_v22 }
 0x18e   : > { %2689 = vmatmul.f32.gmra.mxu1 %v4364_v7  ;;  %2929 = vmatmul.f32.vlgmr.msrb.gmra.mxu3 %v4256_v57 }
 0x18f   : > { %vm3107_vm12 = vcmp.lt.f32.partialorder %v3057_v41, %v3105_v4  ;;  %2894 = vmatmul.f32.vlgmr.msrb.gmra.mxu2 %v4256_v57 }
 0x190   : > { %v3109_v42 = vsel %vm3107_vm12, 1.0, %v3557_v39 }
 0x191   : > { %v3245_v43 = vperm.slane %v3109_v42, 0  ;;  %v3246_v46 = vperm.slane %v3109_v42, 2  ;;  %v4484_v55 = vpop.f32.mrf.mxu3 }
 0x192   : > { %v2131_v29 = vpop.f32.mrf.mxu0  ;;  %v4486_v61 = vpop.f32.mrf.mxu2 }
 0x193   : > { %v3264_v57 = vsel %vm3261_vm11, %v3259_v37, %v3245_v43  ;;  %v3265_v33 = vsel %vm3261_vm11, %v3260_v52, %v3246_v46  ;;  %v2162_v20 = vpop.f32.mrf.mxu1  ;;  %v2132_v8 = vadd.f32 %v2131_v29, %v4451_v62 }
 0x194   : > { %3268 = vst [vmem:[%s4220_s30 + $0x10] sm:$0x3f] %v3264_v57  ;;  %v2163_v47 = vadd.f32 %v2162_v20, %v2128_v51 }
 0x195   : > { %3269 = vst [vmem:[%s4220_s30 + $0x18] sm:$0x3f] %v3265_v33  ;;  %2814 = vmatmul.f32.gmra.mxu0 %v4313_v50  ;;  %v1905_v50 = vadd.f32 %v1897_v0, %v1869_v6 }
 0x196   : > { %2849 = vmatmul.f32.vlgmr.msrb.gmra.mxu1 %v4286_v31  ;;  %2933 = vmatmul.f32.gmra.mxu3 %v4299_v35 }
 0x197   : > { %2898 = vmatmul.f32.gmra.mxu2 %v4299_v35  ;;  %v2945_v45 = vmul.f32 %v2163_v47, %v1905_v50 }
 0x199   : > { %v2260_v63 = vpop.f32.mrf.mxu3 }
 0x19a   : > { %v2135_v31 = vpop.f32.mrf.mxu0  ;;  %v2209_v56 = vpop.f32.mrf.mxu2 }
 0x19b   : > { %v2166_v17 = vpop.f32.mrf.mxu1  ;;  %v2136_v49 = vadd.f32 %v2135_v31, %v4467_v14  ;;  %v2261_v20 = vadd.f32 %v2260_v63, %v2209_v56 }
 0x19c   : > { %v2167_v15 = vadd.f32 %v2166_v17, %v2132_v8 }
 0x19d   : > { %2819 = vmatmul.f32.gmra.mxu0 %v4348_v21  ;;  %v2058_v21 = vadd.f32 %v4471_v27, %v2017_v3 }
 0x19e   : > { %v2947_v35 = vmul.f32 %v2167_v15, %v1907_v1  ;;  %2855 = vmatmul.f32.gmra.mxu1 %v4334_v2  ;;  %2937 = vmatmul.f32.gmra.mxu3 %v4336_v53  ;;  %v1838_v2 = vadd.f32 %v1830_v36, %v3636_v18 }
 0x19f   : > { %2902 = vmatmul.f32.gmra.mxu2 %v4336_v53  ;;  %v2101_v53 = vadd.f32 %v4469_v30, %v2058_v21  ;;  %v2257_v30 = vadd.f32 %v4484_v55, %v4486_v61 }
 0x1a0   : > { %v4519_v62 = vadd.f32 %v2947_v35, %v2945_v45  ;;  %v1842_v5 = vfloor.f32 %v1838_v2 }
 0x1a1   : > { %v2264_v44 = vpop.f32.mrf.mxu3 }
 0x1a2   : > { %v2139_v38 = vpop.f32.mrf.mxu0  ;;  %v2217_v54 = vpop.f32.mrf.mxu2  ;;  %v1846_v25 = vsub.f32 %v1838_v2, %v1842_v5  ;;  %v1878_v42 = vadd.f32 1.0, %v1842_v5  ;;  %v1850_v43 = vperm.slane %v1842_v5, 0 }
 0x1a3   : > { %v2170_v16 = vpop.f32.mrf.mxu1  ;;  %v2140_v59 = vadd.f32 %v2139_v38, %v2101_v53  ;;  %v2265_v45 = vadd.f32 %v2264_v44, %v2217_v54 }
 0x1a4   : > { %v2171_v41 = vadd.f32 %v2170_v16, %v2136_v49  ;;  %v1862_v46 = vsub.f32 1.0, %v1846_v25  ;;  %v1882_v57 = vperm.slane %v1878_v42, 0  ;;  %vm4534_vm2 = vcmp.eq.f32.partialorder %v3655_v32, %v1850_v43 }
 0x1a5   : > { %2824 = vmatmul.f32.gmra.mxu0 %v4374_v40  ;;  %v1894_v9 = vperm.slane %v1846_v25, 0  ;;  %vm4540_vm5 = vcmp.eq.f32.partialorder %v3651_v28, %v1850_v43 }
 0x1a6   : > { %2861 = vmatmul.f32.gmra.mxu1 %v4362_v11  ;;  %2941 = vmatmul.f32.gmra.mxu3 %v4364_v7  ;;  %v2981_v34 = vmul.f32 %v2171_v41, %v1905_v50  ;;  %vm1886_vm4 = vcmp.eq.f32.partialorder %v3655_v32, %v1882_v57  ;;  %vm1888_vm0 = vcmp.eq.f32.partialorder %v3651_v28, %v1882_v57 }
 0x1a7   : > { %2906 = vmatmul.f32.gmra.mxu2 %v4364_v7  ;;  %v1898_v23 = vsel %vm1886_vm4, %v1894_v9, 0.0  ;;  %v1900_v8 = vsel %vm1888_vm0, %v1894_v9, 0.0 }
 0x1a9   : > { %v2268_v60 = vpop.f32.mrf.mxu3 }
 0x1aa   : > { %v2294_v4 = vpop.f32.mrf.mxu0  ;;  %v2225_v58 = vpop.f32.mrf.mxu2 }
 0x1ab   : > { %v2174_v27 = vpop.f32.mrf.mxu1  ;;  %v2295_v29 = vadd.f32 %v2294_v4, %v2257_v30  ;;  %v2269_v41 = vadd.f32 %v2268_v60, %v2225_v58 }
 0x1ac   : > { %v2175_v40 = vadd.f32 %v2174_v27, %v2140_v59  ;;  %v2954_v59 = vrot.slane %v4519_v62, 4 }
 0x1ae   : > { %v2983_v11 = vmul.f32 %v2175_v40, %v1907_v1  ;;  %2867 = vmatmul.f32.gmra.mxu1 %v4399_v19  ;;  %v1866_v19 = vperm.slane %v1862_v46, 0  ;;  %v2955_v42 = vadd.f32 %v2954_v59, %v4519_v62 }
 0x1b0   : > { %v2989_v7 = vadd.f32 %v2983_v11, %v2981_v34  ;;  %v1870_v22 = vsel %vm4534_vm2, %v1866_v19, 0.0  ;;  %v1872_v63 = vsel %vm4540_vm5, %v1866_v19, 0.0  ;;  %v2956_v43 = vrot.slane %v2955_v42, 2 }
 0x1b1   : > { %v2414_v37 = vpop.f32.mrf.mxu3  ;;  %v1906_v47 = vadd.f32 %v1898_v23, %v1870_v22  ;;  %v1908_v56 = vadd.f32 %v1900_v8, %v1872_v63 }
 0x1b2   : > { %v2299_v14 = vpop.f32.mrf.mxu0  ;;  %v2379_v52 = vpop.f32.mrf.mxu2  ;;  %v2990_v44 = vrot.slane %v2989_v7, 4 }
 0x1b3   : > { %v2334_v10 = vpop.f32.mrf.mxu1  ;;  %v2300_v13 = vadd.f32 %v2299_v14, %v2261_v20  ;;  %v2957_v20 = vadd.f32 %v2956_v43, %v2955_v42  ;;  %v3276_v43 = vmul.f32 0.125, %v4448_v26 }
 0x1b4   : > { %v2335_v33 = vadd.f32 %v2334_v10, %v2295_v29  ;;  %v2991_v10 = vadd.f32 %v2990_v44, %v2989_v7  ;;  %v3150_v7 = vmul.f32 %v4448_v26, %v4448_v26 }
 0x1b6   : > { %v2380_v48 = vadd.f32 %v2379_v52, %v2335_v33  ;;  %v2992_v19 = vrot.slane %v2991_v10, 2 }
 0x1b8   : > { %v2415_v31 = vadd.f32 %v2414_v37, %v2380_v48  ;;  %v2993_v48 = vadd.f32 %v2992_v19, %v2991_v10 }
 0x1b9   : > { %v2418_v61 = vpop.f32.mrf.mxu3 }
 0x1ba   : > { %v2304_v6 = vpop.f32.mrf.mxu0  ;;  %v2383_v0 = vpop.f32.mrf.mxu2  ;;  %v2946_v35 = vmul.f32 %v2415_v31, %v1906_v47  ;;  %v2994_v31 = vrot.slane %v2993_v48, 1 }
 0x1bb   : > { %v2340_v51 = vpop.f32.mrf.mxu1  ;;  %v2305_v21 = vadd.f32 %v2304_v6, %v2265_v45  ;;  %v3524_v45 = vrot.slane %v3150_v7, 9 }
 0x1bc   : > { %v2341_v50 = vadd.f32 %v2340_v51, %v2300_v13 }
 0x1be   : > { %v2384_v1 = vadd.f32 %v2383_v0, %v2341_v50  ;;  %v2958_v0 = vrot.slane %v2957_v20, 1 }
 0x1c0   : > { %v2419_v17 = vadd.f32 %v2418_v61, %v2384_v1 }
 0x1c1   : > { %v2422_v15 = vpop.f32.mrf.mxu3 }
 0x1c2   : > { %v2948_v3 = vmul.f32 %v2419_v17, %v1908_v56  ;;  %v2309_v38 = vpop.f32.mrf.mxu0  ;;  %v2387_v16 = vpop.f32.mrf.mxu2 }
 0x1c3   : > { %v2346_v36 = vpop.f32.mrf.mxu1  ;;  %v2310_v40 = vadd.f32 %v2309_v38, %v2269_v41  ;;  %v3160_v41 = vadd.f32 %v3524_v45, %v3150_v7 }
 0x1c4   : > { %v2960_v2 = vadd.f32 %v2948_v3, %v2946_v35  ;;  %v2347_v49 = vadd.f32 %v2346_v36, %v2305_v21  ;;  %v4556_v36 = vld [vmem:[%s3851_s14 + $0x4] sm:$0xf] }
 0x1c5   : > { %v1831_v21 = vperm.slane %v4556_v36, 1 }
 0x1c6   : > { %v2961_v53 = vrot.slane %v2960_v2, 4  ;;  %v2388_v34 = vadd.f32 %v2387_v16, %v2347_v49  ;;  %v2995_v16 = vadd.f32 %v2994_v31, %v2993_v48 }
 0x1c8   : > { %v2962_v4 = vadd.f32 %v2961_v53, %v2960_v2  ;;  %v2423_v14 = vadd.f32 %v2422_v15, %v2388_v34 }
 0x1c9   : > { %v2426_v27 = vpop.f32.mrf.mxu3 }
 0x1ca   : > { %v2963_v5 = vrot.slane %v2962_v4, 2  ;;  %v2465_v11 = vpop.f32.mrf.mxu0  ;;  %v2391_v25 = vpop.f32.mrf.mxu2  ;;  %v2982_v58 = vmul.f32 %v2423_v14, %v1906_v47 }
 0x1cb   : > { %v2352_v54 = vpop.f32.mrf.mxu1 }
 0x1cc   : > { %v2353_v37 = vadd.f32 %v2352_v54, %v2310_v40  ;;  %v2964_v30 = vadd.f32 %v2963_v5, %v2962_v4  ;;  %v1839_v54 = vadd.f32 %v1831_v21, %v3629_v12 }
 0x1ce   : > { %v2392_v52 = vadd.f32 %v2391_v25, %v2353_v37  ;;  %v2965_v60 = vrot.slane %v2964_v30, 1  ;;  %v3178_v25 = vmul.f32 %v2995_v16, %v2995_v16 }
 0x1d0   : > { %v2427_v46 = vadd.f32 %v2426_v27, %v2392_v52  ;;  %v2966_v13 = vadd.f32 %v2965_v60, %v2964_v30 }
 0x1d1   : > { %v2598_v29 = vpop.f32.mrf.mxu3 }
 0x1d2   : > { %v2984_v57 = vmul.f32 %v2427_v46, %v1908_v56  ;;  %v2473_v33 = vpop.f32.mrf.mxu0  ;;  %v2558_v24 = vpop.f32.mrf.mxu2  ;;  %v3163_v63 = vmul.f32 %v2966_v13, %v2966_v13  ;;  %v2959_v56 = vadd.f32 %v2958_v0, %v2957_v20  ;;  %v3114_v53 = vrot.slane %v2966_v13, 6  ;;  %v3282_v13 = vld.sshfl [vmem:[#allocation1 + $0x8] sm:$0xff pattern:$0x75316420] }
 0x1d3   : > { %v2520_v9 = vpop.f32.mrf.mxu1  ;;  %v3294_v20 = vperm.slane %v3276_v43, 2 }
 0x1d4   : > { %v2996_v55 = vadd.f32 %v2984_v57, %v2982_v58  ;;  %v2521_v61 = vadd.f32 %v2520_v9, %v2465_v11  ;;  %v3170_v35 = vrot.slane %v3163_v63, 6  ;;  %v3162_v2 = vmul.f32 %v2959_v56, %v2959_v56 }
 0x1d5   : > { %v3116_v42 = vsel %vm3023_vm3, %v2959_v56, %v3114_v53  ;;  %v3293_v9 = vperm.slane %v3276_v43, 0  ;;  %v3320_v31 = vsel %vm3251_vm6, %v3282_v13, %v3294_v20 }
 0x1d6   : > { %v2997_v62 = vrot.slane %v2996_v55, 4  ;;  %v2559_v6 = vadd.f32 %v2558_v24, %v2521_v61  ;;  %v3172_v27 = vsel %vm3023_vm3, %v3162_v2, %v3170_v35  ;;  %v3120_v60 = vadd.f32 %v4448_v26, %v3116_v42  ;;  %v3281_v61 = vld.sshfl [vmem:[#allocation1] sm:$0xff pattern:$0x75316420] }
 0x1d7   : > { %v3176_v52 = vadd.f32 %v3172_v27, %v3160_v41 }
 0x1d8   : > { %v2998_v22 = vadd.f32 %v2997_v62, %v2996_v55  ;;  %v4553_v23 = vadd.f32 %v2598_v29, %v2559_v6  ;;  %v3136_v6 = vmul.f32 %v3120_v60, %v3120_v60 }
 0x1d9   : > { %v2604_v51 = vpop.f32.mrf.mxu3 }
 0x1da   : > { %v2999_v8 = vrot.slane %v2998_v22, 2  ;;  %v2481_v50 = vpop.f32.mrf.mxu0  ;;  %v2563_v47 = vpop.f32.mrf.mxu2 }
 0x1db   : > { %v2524_v1 = vpop.f32.mrf.mxu1 }
 0x1dc   : > { %v3000_v17 = vadd.f32 %v2999_v8, %v2998_v22  ;;  %v2525_v15 = vadd.f32 %v2524_v1, %v2473_v33  ;;  %v1843_v33 = vfloor.f32 %v1839_v54 }
 0x1de   : > { %v3001_v3 = vrot.slane %v3000_v17, 1  ;;  %v2564_v38 = vadd.f32 %v2563_v47, %v2525_v15  ;;  %v1847_v7 = vsub.f32 %v1839_v54, %v1843_v33  ;;  %v1879_v63 = vadd.f32 1.0, %v1843_v33 }
 0x1df   : > { %v3319_v47 = vsel %vm3251_vm6, %v3281_v61, %v3293_v9  ;;  %v1851_v1 = vperm.slane %v1843_v33, 0  ;;  %v1832_v9 = vperm.slane %v4556_v36, 3 }
 0x1e0   : > { %v3002_v49 = vadd.f32 %v3001_v3, %v3000_v17  ;;  %v4559_v59 = vadd.f32 %v2604_v51, %v2564_v38  ;;  %v3302_v51 = vperm.slane %v3276_v43, 3  ;;  %v1863_v56 = vsub.f32 1.0, %v1847_v7 }
 0x1e1   : > { %v2610_v4 = vpop.f32.mrf.mxu3  ;;  %v1883_v35 = vperm.slane %v1879_v63, 0  ;;  %vm1857_vm8 = vcmp.eq.f32.partialorder %v3655_v32, %v1851_v1  ;;  %vm1859_vm12 = vcmp.eq.f32.partialorder %v3651_v28, %v1851_v1  ;;  %v1840_v20 = vadd.f32 %v1832_v9, %v3636_v18 }
 0x1e2   : > { %v3126_v5 = vrot.slane %v3002_v49, 6  ;;  %v3179_v40 = vmul.f32 %v3002_v49, %v3002_v49  ;;  %v4562_v34 = vpop.f32.mrf.mxu0  ;;  %v2568_v11 = vpop.f32.mrf.mxu2  ;;  %v3324_v45 = vsel %vm3256_vm9, %v3320_v31, %v3302_v51  ;;  %v1867_v41 = vperm.slane %v1863_v56, 0 }
 0x1e3   : > { %v2528_v44 = vpop.f32.mrf.mxu1  ;;  %vm1889_vm10 = vcmp.eq.f32.partialorder %v3655_v32, %v1883_v35  ;;  %vm1891_vm13 = vcmp.eq.f32.partialorder %v3651_v28, %v1883_v35 }
 0x1e4   : > { %v3128_v37 = vsel %vm3023_vm3, %v2995_v16, %v3126_v5  ;;  %v3186_v30 = vrot.slane %v3179_v40, 6  ;;  %v2529_v14 = vadd.f32 %v2528_v44, %v2481_v50  ;;  %v1873_v5 = vsel %vm1857_vm8, %v1867_v41, 0.0 }
 0x1e5   : > { %v3130_v10 = vrot.slane %v3128_v37, 7 }
 0x1e6   : > { %v3188_v46 = vsel %vm3023_vm3, %v3178_v25, %v3186_v30  ;;  %v2569_v29 = vadd.f32 %v2568_v11, %v2529_v14  ;;  %v1875_v11 = vsel %vm1859_vm12, %v1867_v41, 0.0 }
 0x1e7   : > { %v3134_v58 = vadd.f32 %v4448_v26, %v3130_v10  ;;  %v3192_v57 = vadd.f32 %v3188_v46, %v3176_v52  ;;  %v3301_v26 = vperm.slane %v3276_v43, 1 }
 0x1e8   : > { %v4571_v12 = vadd.f32 %v2610_v4, %v2569_v29  ;;  %v1895_v4 = vperm.slane %v1847_v7, 0 }
 0x1e9   : > { %v3138_v24 = vmul.f32 %v3134_v58, %v3134_v58  ;;  %v3194_v19 = vmul.f32 0.01, %v3192_v57  ;;  %v4573_v55 = vpop.f32.mrf.mxu3  ;;  %v3323_v15 = vsel %vm3256_vm9, %v3319_v47, %v3301_v26  ;;  %v1844_v26 = vfloor.f32 %v1840_v20 }
 0x1ea   : > { %v2643_v62 = vpop.f32.mrf.mxu0  ;;  %v2573_v48 = vpop.f32.mrf.mxu2  ;;  %v1901_v40 = vsel %vm1889_vm10, %v1895_v4, 0.0  ;;  %v1903_v25 = vsel %vm1891_vm13, %v1895_v4, 0.0 }
 0x1eb   : > { %v3522_v0 = vrot.slane %v3138_v24, 9  ;;  %v2532_v22 = vpop.f32.mrf.mxu1  ;;  %v3196_v50 = vadd.f32 0.5, %v3194_v19  ;;  %v2644_v44 = vadd.f32 %v2643_v62, %v4553_v23  ;;  %v1909_v37 = vadd.f32 %v1901_v40, %v1873_v5 }
 0x1ec   : > { %v1911_v52 = vadd.f32 %v1903_v25, %v1875_v11  ;;  %v2533_v58 = vadd.f32 %v2532_v22, %v4562_v34  ;;  %v1880_v31 = vadd.f32 1.0, %v1844_v26 }
 0x1ed   : > { %v3148_v8 = vadd.f32 %v3522_v0, %v3136_v6 }
 0x1ef   : > { %vm3198_vm7 = vcmp.lt.f32.partialorder %v3148_v8, %v3196_v50  ;;  %v1848_v50 = vsub.f32 %v1840_v20, %v1844_v26 }
 0x1f0   : > { %v3200_v17 = vsel %vm3198_vm7, 1.0, %v3557_v39 }
 0x1f1   : > { %v3311_v3 = vperm.slane %v3200_v17, 0  ;;  %v3312_v38 = vperm.slane %v3200_v17, 2  ;;  %v2772_v16 = vpop.f32.mrf.mxu3  ;;  %v1852_v17 = vperm.slane %v1844_v26, 0 }
 0x1f2   : > { %v2647_v21 = vpop.f32.mrf.mxu0  ;;  %v2717_v2 = vpop.f32.mrf.mxu2 }
 0x1f3   : > { %v3327_v53 = vsel %vm3261_vm11, %v3323_v15, %v3311_v3  ;;  %v3328_v49 = vsel %vm3261_vm11, %v3324_v45, %v3312_v38  ;;  %v2678_v27 = vpop.f32.mrf.mxu1  ;;  %v2648_v42 = vadd.f32 %v2647_v21, %v4559_v59  ;;  %v2574_v59 = vadd.f32 %v2573_v48, %v2533_v58 }
 0x1f4   : > { %3331 = vst [vmem:[%s4585_s10] sm:$0x3f] %v3327_v53  ;;  %v2679_v30 = vadd.f32 %v2678_v27, %v2644_v44  ;;  %v2773_v1 = vadd.f32 %v2772_v16, %v2717_v2  ;;  %v1884_v45 = vperm.slane %v1880_v31, 0  ;;  %vm4605_vm14 = vcmp.eq.f32.partialorder %v3655_v32, %v1852_v17 }
 0x1f5   : > { %3332 = vst [vmem:[%s4585_s10 + $0x8] sm:$0x3f] %v3328_v49  ;;  %v2617_v61 = vadd.f32 %v4573_v55, %v2574_v59  ;;  %v1896_v21 = vperm.slane %v1848_v50, 0  ;;  %vm4611_vm1 = vcmp.eq.f32.partialorder %v3651_v28, %v1852_v17  ;;  %v3151_v3 = vmul.f32 %v4556_v36, %v4556_v36 }
 0x1f6   : > { %v2949_v29 = vmul.f32 %v2679_v30, %v1909_v37  ;;  %vm1890_vm15 = vcmp.eq.f32.partialorder %v3655_v32, %v1884_v45  ;;  %vm1892_vm2 = vcmp.eq.f32.partialorder %v3651_v28, %v1884_v45 }
 0x1f7   : > { %v1902_v5 = vsel %vm1890_vm15, %v1896_v21, 0.0  ;;  %v1904_v32 = vsel %vm1892_vm2, %v1896_v21, 0.0 }
 0x1f9   : > { %v2776_v54 = vpop.f32.mrf.mxu3 }
 0x1fa   : > { %v2651_v14 = vpop.f32.mrf.mxu0  ;;  %v2725_v10 = vpop.f32.mrf.mxu2 }
 0x1fb   : > { %v2682_v43 = vpop.f32.mrf.mxu1  ;;  %v2652_v13 = vadd.f32 %v2651_v14, %v4571_v12  ;;  %v1864_v12 = vsub.f32 1.0, %v1848_v50  ;;  %v2777_v53 = vadd.f32 %v2776_v54, %v2725_v10 }
 0x1fc   : > { %v2683_v46 = vadd.f32 %v2682_v43, %v2648_v42 }
 0x1fd   : > { %v1868_v38 = vperm.slane %v1864_v12, 0 }
 0x1fe   : > { %v2951_v60 = vmul.f32 %v2683_v46, %v1911_v52 }
 0x1ff   : > { %v1874_v27 = vsel %vm4605_vm14, %v1868_v38, 0.0  ;;  %v1876_v11 = vsel %vm4611_vm1, %v1868_v38, 0.0 }
 0x200   : > { %v4598_v57 = vadd.f32 %v2951_v60, %v2949_v29  ;;  %v1910_v54 = vadd.f32 %v1902_v5, %v1874_v27  ;;  %v1912_v30 = vadd.f32 %v1904_v32, %v1876_v11 }
 0x201   : > { %v2780_v33 = vpop.f32.mrf.mxu3 }
 0x202   : > { %v2655_v24 = vpop.f32.mrf.mxu0  ;;  %v2733_v19 = vpop.f32.mrf.mxu2  ;;  %v2968_v59 = vrot.slane %v4598_v57, 4 }
 0x203   : > { %v2686_v23 = vpop.f32.mrf.mxu1  ;;  %v2656_v6 = vadd.f32 %v2655_v24, %v2617_v61  ;;  %v2781_v14 = vadd.f32 %v2780_v33, %v2733_v19 }
 0x204   : > { %v2687_v0 = vadd.f32 %v2686_v23, %v2652_v13  ;;  %v2969_v33 = vadd.f32 %v2968_v59, %v4598_v57  ;;  %v3286_v59 = vld.sshfl [vmem:[#allocation1 + $0x18] sm:$0xff pattern:$0x75316420] }
 0x206   : > { %v2985_v63 = vmul.f32 %v2687_v0, %v1909_v37  ;;  %v2970_v31 = vrot.slane %v2969_v33, 2 }
 0x209   : > { %v2784_v62 = vpop.f32.mrf.mxu3 }
 0x20a   : > { %v2810_v7 = vpop.f32.mrf.mxu0  ;;  %v2741_v34 = vpop.f32.mrf.mxu2 }
 0x20b   : > { %v2690_v22 = vpop.f32.mrf.mxu1  ;;  %v2811_v15 = vadd.f32 %v2810_v7, %v2773_v1  ;;  %v2785_v20 = vadd.f32 %v2784_v62, %v2741_v34  ;;  %v2971_v34 = vadd.f32 %v2970_v31, %v2969_v33 }
 0x20c   : > { %v2691_v51 = vadd.f32 %v2690_v22, %v2656_v6 }
 0x20d   : > { %v2972_v45 = vrot.slane %v2971_v34, 1 }
 0x20e   : > { %v2987_v8 = vmul.f32 %v2691_v51, %v1911_v52 }
 0x210   : > { %v3003_v47 = vadd.f32 %v2987_v8, %v2985_v63 }
 0x211   : > { %v2930_v48 = vpop.f32.mrf.mxu3 }
 0x212   : > { %v2895_v18 = vpop.f32.mrf.mxu2  ;;  %v2815_v56 = vpop.f32.mrf.mxu0  ;;  %v3004_v19 = vrot.slane %v3003_v47, 4 }
 0x213   : > { %v2850_v55 = vpop.f32.mrf.mxu1  ;;  %v2816_v49 = vadd.f32 %v2815_v56, %v2777_v53  ;;  %v2973_v53 = vadd.f32 %v2972_v45, %v2971_v34 }
 0x214   : > { %v2851_v35 = vadd.f32 %v2850_v55, %v2811_v15 }
 0x216   : > { %v2896_v41 = vadd.f32 %v2895_v18, %v2851_v35 }
 0x218   : > { %v2931_v42 = vadd.f32 %v2930_v48, %v2896_v41  ;;  %v3005_v48 = vadd.f32 %v3004_v19, %v3003_v47 }
 0x219   : > { %v2934_v2 = vpop.f32.mrf.mxu3 }
 0x21a   : > { %v2899_v4 = vpop.f32.mrf.mxu2  ;;  %v2820_v44 = vpop.f32.mrf.mxu0  ;;  %v2950_v52 = vmul.f32 %v2931_v42, %v1910_v54  ;;  %v3006_v55 = vrot.slane %v3005_v48, 2 }
 0x21b   : > { %v2856_v40 = vpop.f32.mrf.mxu1  ;;  %v2821_v60 = vadd.f32 %v2820_v44, %v2781_v14 }
 0x21c   : > { %v2857_v25 = vadd.f32 %v2856_v40, %v2816_v49  ;;  %v3007_v35 = vadd.f32 %v3006_v55, %v3005_v48 }
 0x21e   : > { %v2900_v37 = vadd.f32 %v2899_v4, %v2857_v25  ;;  %v3008_v16 = vrot.slane %v3007_v35, 1  ;;  %v3164_v4 = vmul.f32 %v2973_v53, %v2973_v53 }
 0x220   : > { %v2935_v28 = vadd.f32 %v2934_v2, %v2900_v37  ;;  %v3525_v2 = vrot.slane %v3151_v3, 9  ;;  %v3009_v27 = vadd.f32 %v3008_v16, %v3007_v35 }
 0x221   : > { %v2938_v29 = vpop.f32.mrf.mxu3 }
 0x222   : > { %v2952_v10 = vmul.f32 %v2935_v28, %v1912_v30  ;;  %v2903_v43 = vpop.f32.mrf.mxu2  ;;  %v2825_v9 = vpop.f32.mrf.mxu0  ;;  %v3161_v11 = vadd.f32 %v3525_v2, %v3151_v3 }
 0x223   : > { %v2862_v46 = vpop.f32.mrf.mxu1  ;;  %v2826_v6 = vadd.f32 %v2825_v9, %v2785_v20  ;;  %v3285_v9 = vld.sshfl [vmem:[#allocation1 + $0x10] sm:$0xff pattern:$0x75316420] }
 0x224   : > { %v2974_v58 = vadd.f32 %v2952_v10, %v2950_v52  ;;  %v2863_v23 = vadd.f32 %v2862_v46, %v2821_v60  ;;  %v3277_v52 = vmul.f32 0.125, %v4556_v36 }
 0x226   : > { %v2975_v24 = vrot.slane %v2974_v58, 4  ;;  %v2904_v0 = vadd.f32 %v2903_v43, %v2863_v23  ;;  %v3296_v23 = vperm.slane %v3277_v52, 2 }
 0x228   : > { %v2976_v61 = vadd.f32 %v2975_v24, %v2974_v58  ;;  %v2939_v8 = vadd.f32 %v2938_v29, %v2904_v0  ;;  %v3295_v24 = vperm.slane %v3277_v52, 0  ;;  %v3322_v33 = vsel %vm3251_vm6, %v3286_v59, %v3296_v23 }
 0x229   : > { %v2942_v51 = vpop.f32.mrf.mxu3 }
 0x22a   : > { %v2977_v13 = vrot.slane %v2976_v61, 2  ;;  %v2907_v22 = vpop.f32.mrf.mxu2  ;;  %v2986_v56 = vmul.f32 %v2939_v8, %v1910_v54  ;;  %v3180_v54 = vmul.f32 %v3009_v27, %v3009_v27 }
 0x22b   : > { %v2868_v7 = vpop.f32.mrf.mxu1 }
 0x22c   : > { %v2869_v26 = vadd.f32 %v2868_v7, %v2826_v6  ;;  %v2978_v63 = vadd.f32 %v2977_v13, %v2976_v61  ;;  %v3303_v13 = vperm.slane %v3277_v52, 1  ;;  %v3304_v6 = vperm.slane %v3277_v52, 3 }
 0x22e   : > { %v2908_v50 = vadd.f32 %v2907_v22, %v2869_v26  ;;  %v2979_v18 = vrot.slane %v2978_v63, 1  ;;  %v3321_v22 = vsel %vm3251_vm6, %v3285_v9, %v3295_v24  ;;  %v3326_v26 = vsel %vm3256_vm9, %v3322_v33, %v3304_v6 }
 0x22f   : > { %v3325_v19 = vsel %vm3256_vm9, %v3321_v22, %v3303_v13 }
 0x230   : > { %v2943_v1 = vadd.f32 %v2942_v51, %v2908_v50  ;;  %v2980_v12 = vadd.f32 %v2979_v18, %v2978_v63 }
 0x232   : > { %v2988_v62 = vmul.f32 %v2943_v1, %v1912_v30  ;;  %v3165_v38 = vmul.f32 %v2980_v12, %v2980_v12  ;;  %v3115_v5 = vrot.slane %v2980_v12, 6 }
 0x234   : > { %v3010_v17 = vadd.f32 %v2988_v62, %v2986_v56  ;;  %v3171_v49 = vrot.slane %v3165_v38, 6  ;;  %v3117_v42 = vsel %vm3023_vm3, %v2973_v53, %v3115_v5 }
 0x235   : > { %v3121_v43 = vadd.f32 %v4556_v36, %v3117_v42 }
 0x236   : > { %v3011_v15 = vrot.slane %v3010_v17, 4  ;;  %v3173_v32 = vsel %vm3023_vm3, %v3164_v4, %v3171_v49 }
 0x237   : > { %v3177_v28 = vadd.f32 %v3173_v32, %v3161_v11  ;;  %v3137_v20 = vmul.f32 %v3121_v43, %v3121_v43 }
 0x238   : > { %v3012_v57 = vadd.f32 %v3011_v15, %v3010_v17 }
 0x23a   : > { %v3013_v21 = vrot.slane %v3012_v57, 2 }
 0x23c   : > { %v3014_v47 = vadd.f32 %v3013_v21, %v3012_v57 }
 0x23e   : > { %v3015_v41 = vrot.slane %v3014_v47, 1 }
 0x240   : > { %v3016_v40 = vadd.f32 %v3015_v41, %v3014_v47 }
 0x242   : > { %v3127_v25 = vrot.slane %v3016_v40, 6  ;;  %v3181_v44 = vmul.f32 %v3016_v40, %v3016_v40 }
 0x244   : > { %v3129_v37 = vsel %vm3023_vm3, %v3009_v27, %v3127_v25  ;;  %v3187_v30 = vrot.slane %v3181_v44, 6 }
 0x245   : > { %v3131_v14 = vrot.slane %v3129_v37, 7 }
 0x246   : > { %v3189_v10 = vsel %vm3023_vm3, %v3180_v54, %v3187_v30 }
 0x247   : > { %v3135_v46 = vadd.f32 %v4556_v36, %v3131_v14  ;;  %v3193_v29 = vadd.f32 %v3189_v10, %v3177_v28 }
 0x249   : > { %v3139_v60 = vmul.f32 %v3135_v46, %v3135_v46  ;;  %v3195_v58 = vmul.f32 0.01, %v3193_v29 }
 0x24b   : > { %v3523_v61 = vrot.slane %v3139_v60, 9  ;;  %v3197_v7 = vadd.f32 0.5, %v3195_v58 }
 0x24d   : > { %v3149_v0 = vadd.f32 %v3523_v61, %v3137_v20 }
 0x24f   : > { %vm3199_vm3 = vcmp.lt.f32.partialorder %v3149_v0, %v3197_v7 }
 0x250   : > { %v3201_v36 = vsel %vm3199_vm3, 1.0, %v3557_v39 }
 0x251   : > { %v3313_v51 = vperm.slane %v3201_v36, 0  ;;  %v3314_v63 = vperm.slane %v3201_v36, 2 }
 0x253   : > { %v3329_v8 = vsel %vm3261_vm11, %v3325_v19, %v3313_v51  ;;  %v3330_v50 = vsel %vm3261_vm11, %v3326_v26, %v3314_v63 }
 0x254   : > { %3333 = vst [vmem:[%s4585_s10 + $0x10] sm:$0x3f] %v3329_v8 }
 0x255   : > { %3334 = vst [vmem:[%s4585_s10 + $0x18] sm:$0x3f] %v3330_v50 }
 0x256 PF: > { %s18_s24 = sadd.s32 1, %s3555_s24  }
 0x257   : > { %p15_p4 = scmp.ge.s32.totalorder %s18_s24, 4  }
 0x259   :  { %17 = sbr.rel (!%p15_p4) target bundleno = 1 (0x1), region = 103 }

</bundles_post_ra>
